<compile_context>
chip_gen: v7x
topology: tpu7x:2x2x1
jax: 0.10.0
libtpu: 0.0.40
codegen_flags: <defaults>
</compile_context>

<pallas_src>
import jax
import jax.numpy as jnp
from jax.experimental import pallas as pl
from jax.experimental.pallas import tpu as pltpu

_LANE = 128
_SUB = 8


def _round_up(x, m):
    return ((x + m - 1) // m) * m


def _decoder_kernel(x_ref, h0_ref, wih_ref, whh_ref, bih_ref, bhn_ref,
                    wreg_ref, breg_ref, out_ref, hout_ref, gi_ref):
    """Whole GRU recurrence + regression head, everything resident in VMEM.

    x_ref:    (L*Np, F)    time-major, batch-padded, pre-flattened input
    h0_ref:   (Np, HP)     initial hidden state (hidden padded to HP lanes)
    wih_ref:  (F, 3*HP)    fused input->gate weights, gate order [r | z | n]
    whh_ref:  (HP, 3*HP)   fused hidden->gate weights, same gate order
    bih_ref:  (1, 3*HP)    fused biases: [b_ir+b_hr | b_iz+b_hz | b_in]
    bhn_ref:  (1, HP)      b_hn (scaled by r inside the recurrence)
    wreg_ref: (HP, Fp)     regression weights
    breg_ref: (1, Fp)      regression bias
    out_ref:  (Np, Fp)     regression of last GRU output (lane-dense slab)
    hout_ref: (Np, HP)     final hidden state (lane-dense slab)
    gi_ref:   (L*Np, 3*HP) VMEM scratch staging the hoisted input projection
    """
    LN = x_ref.shape[0]
    Np, HP = h0_ref.shape
    L = LN // Np

    # ---- Hoisted, fused input projection: ONE (L*Np,F) @ (F,3HP) matmul. ----
    # Staged through VMEM scratch so it is not held live in vregs across the
    # unrolled recurrence.
    gi_ref[...] = (jnp.dot(x_ref[...], wih_ref[...],
                           preferred_element_type=jnp.float32)
                   + bih_ref[...])

    # Hoist the b_hn broadcast once (JAX does not CSE broadcast_in_dim).
    b_hn = jnp.broadcast_to(bhn_ref[...], (Np, HP))

    h = h0_ref[...]
    # Fully unrolled serial recurrence (L is small & static).  Per step: one
    # fused (Np,HP)@(HP,3HP) MXU matmul, lane-aligned slices (HP % 128 == 0),
    # EUP sigmoid/tanh and VPU gate math.  whh_ref is read inside the body so
    # the weight loads sit next to their use instead of pinning vregs.
    for t in range(L):
        gh = jnp.dot(h, whh_ref[...], preferred_element_type=jnp.float32)
        gi_t = gi_ref[t * Np:(t + 1) * Np, :]          # cheap per-step vld
        r = jax.nn.sigmoid(gi_t[:, 0:HP] + gh[:, 0:HP])
        z = jax.nn.sigmoid(gi_t[:, HP:2 * HP] + gh[:, HP:2 * HP])
        n = jnp.tanh(gi_t[:, 2 * HP:3 * HP]
                     + r * (gh[:, 2 * HP:3 * HP] + b_hn))
        h = (1.0 - z) * n + z * h

    hout_ref[...] = h
    out_ref[...] = (jnp.dot(h, wreg_ref[...],
                            preferred_element_type=jnp.float32)
                    + breg_ref[...])


def pack_decoder_params(params):
    """One-time repack of PyTorch-layout GRU/Linear weights into the fused,
    lane-dense layout the kernel expects (hoisted out of the forward pass)."""
    f32 = jnp.float32
    w_ih = params["w_ih"].astype(f32)     # (3H, F), gate order (r, z, n)
    w_hh = params["w_hh"].astype(f32)     # (3H, H)
    b_ih = params["b_ih"].astype(f32)     # (3H,)
    b_hh = params["b_hh"].astype(f32)     # (3H,)
    w_reg = params["w_reg"].astype(f32)   # (F, H)
    b_reg = params["b_reg"].astype(f32)   # (F,)

    H = w_hh.shape[1]
    F = w_ih.shape[1]
    HP = _round_up(H, _LANE)
    Fp = _round_up(F, _LANE)

    def gate(w, g):
        return w[g * H:(g + 1) * H]

    # Fused weights: gate g occupies lanes [g*HP, g*HP + H); padding is zero
    # so padded hidden lanes stay inert through the GRU update.
    wih = jnp.concatenate(
        [jnp.pad(gate(w_ih, g).T, ((0, 0), (0, HP - H))) for g in range(3)],
        axis=1)                                                  # (F, 3*HP)
    whh = jnp.concatenate(
        [jnp.pad(gate(w_hh, g).T, ((0, HP - H), (0, HP - H)))
         for g in range(3)], axis=1)                             # (HP, 3*HP)

    # Bias folding: r/z gates take b_ih + b_hh; n keeps b_in fused while b_hn
    # stays separate (it must be scaled by r in the recurrence).
    b_r = b_ih[0:H] + b_hh[0:H]
    b_z = b_ih[H:2 * H] + b_hh[H:2 * H]
    b_in = b_ih[2 * H:3 * H]
    b_hn = b_hh[2 * H:3 * H]
    bih = jnp.concatenate(
        [jnp.pad(b, (0, HP - H)) for b in (b_r, b_z, b_in)]
    ).reshape(1, 3 * HP)                                         # (1, 3*HP)
    bhn = jnp.pad(b_hn, (0, HP - H)).reshape(1, HP)              # (1, HP)

    wreg = jnp.pad(w_reg.T, ((0, HP - H), (0, Fp - F)))          # (HP, Fp)
    breg = jnp.pad(b_reg, (0, Fp - F)).reshape(1, Fp)            # (1, Fp)

    return {"wih": wih, "whh": whh, "bih": bih, "bhn": bhn,
            "wreg": wreg, "breg": breg}


@jax.jit
def decoder_forward(packed, X, hidden):
    """Forward pass matching the PyTorch Decoder.

    packed: output of pack_decoder_params.  X: (N, L, F).  hidden: (1, N, H).
    Returns (out, new_hidden): out (N, 1, F); new_hidden (1, N, H) is what
    self.hidden would hold after the call.
    """
    f32 = jnp.float32
    N, L, F = X.shape
    H = hidden.shape[2]
    HP = packed["whh"].shape[0]
    Fp = packed["wreg"].shape[1]
    Np = _round_up(max(N, _SUB), _SUB)        # pad batch to the sublane tile

    # Time-major, batch-padded, pre-flattened in the wrapper: the equivalent
    # in-kernel reshape of an (L, Np, 4)-shaped ref would be a relayout copy.
    x = jnp.transpose(X.astype(f32), (1, 0, 2))             # (L, N, F)
    x = jnp.pad(x, ((0, 0), (0, Np - N), (0, 0)))           # (L, Np, F)
    x = x.reshape(L * Np, F)                                 # (L*Np, F)
    h0 = jnp.pad(hidden[0].astype(f32),
                 ((0, Np - N), (0, HP - H)))                 # (Np, HP)

    # Advisory cost estimate for the XLA scheduler.
    flops = int(2 * L * Np * F * 3 * HP          # hoisted input projection
                + 2 * L * Np * HP * 3 * HP       # fused recurrent matmuls
                + 2 * Np * HP * Fp               # regression head
                + 10 * L * Np * HP)              # gate elementwise
    transcendentals = int(3 * L * Np * HP)
    bytes_accessed = int(4 * (x.size + h0.size + packed["wih"].size
                              + packed["whh"].size + packed["bih"].size
                              + packed["bhn"].size + packed["wreg"].size
                              + packed["breg"].size + Np * Fp + Np * HP))

    vmem = pl.BlockSpec(memory_space=pltpu.MemorySpace.VMEM)
    out_p, h_p = pl.pallas_call(
        _decoder_kernel,
        out_shape=(
            jax.ShapeDtypeStruct((Np, Fp), f32),
            jax.ShapeDtypeStruct((Np, HP), f32),
        ),
        in_specs=[vmem] * 8,
        out_specs=(vmem, vmem),
        scratch_shapes=[pltpu.VMEM((L * Np, 3 * HP), f32)],
        # Reuse the hidden-state input buffer for the new hidden state
        # (autoregressive decoding avoids an extra HBM round trip).
        input_output_aliases={1: 1},
        cost_estimate=pl.CostEstimate(flops=flops,
                                      transcendentals=transcendentals,
                                      bytes_accessed=bytes_accessed),
    )(x, h0, packed["wih"], packed["whh"], packed["bih"], packed["bhn"],
      packed["wreg"], packed["breg"])

    out = out_p[:N, :F].reshape(N, 1, F)
    new_hidden = h_p[:N, :H][None, :, :]
    return out, new_hidden


def _reference_forward(params, X, hidden):
    """Pure-JAX reference of the PyTorch Decoder forward (sanity check)."""
    H = params["w_hh"].shape[1]
    h = hidden[0]

    def step(h, x_t):
        gi = x_t @ params["w_ih"].T + params["b_ih"]
        gh = h @ params["w_hh"].T + params["b_hh"]
        r = jax.nn.sigmoid(gi[:, :H] + gh[:, :H])
        z = jax.nn.sigmoid(gi[:, H:2 * H] + gh[:, H:2 * H])
        n = jnp.tanh(gi[:, 2 * H:] + r * gh[:, 2 * H:])
        h_new = (1.0 - z) * n + z * h
        return h_new, h_new

    h_last, _ = jax.lax.scan(step, h, jnp.transpose(X, (1, 0, 2)))
    out = h_last @ params["w_reg"].T + params["b_reg"]
    return out.reshape(X.shape[0], 1, -1), h_last[None, :, :]


def init_params(key, n_features, hidden_dim):
    """Deterministic init matching PyTorch GRU/Linear parameter shapes."""
    ks = jax.random.split(key, 6)
    s = 1.0 / jnp.sqrt(hidden_dim)
    return {
        "w_ih": jax.random.uniform(ks[0], (3 * hidden_dim, n_features),
                                   minval=-s, maxval=s, dtype=jnp.float32),
        "w_hh": jax.random.uniform(ks[1], (3 * hidden_dim, hidden_dim),
                                   minval=-s, maxval=s, dtype=jnp.float32),
        "b_ih": jax.random.uniform(ks[2], (3 * hidden_dim,),
                                   minval=-s, maxval=s, dtype=jnp.float32),
        "b_hh": jax.random.uniform(ks[3], (3 * hidden_dim,),
                                   minval=-s, maxval=s, dtype=jnp.float32),
        "w_reg": jax.random.uniform(ks[4], (n_features, hidden_dim),
                                    minval=-s, maxval=s, dtype=jnp.float32),
        "b_reg": jax.random.uniform(ks[5], (n_features,),
                                    minval=-s, maxval=s, dtype=jnp.float32),
    }


if __name__ == "__main__":
    batch, seq, n_features, hidden_dim = 2, 8, 4, 32

    key = jax.random.PRNGKey(0)
    k_params, k_x, k_h = jax.random.split(key, 3)

    params = init_params(k_params, n_features, hidden_dim)
    packed = pack_decoder_params(params)       # one-time, parameter-load cost

    X = jax.random.normal(k_x, (batch, seq, n_features), dtype=jnp.float32)
    # self.hidden as set by init_hidden: (1, batch, hidden_dim)
    hidden = jax.random.normal(k_h, (1, batch, hidden_dim), dtype=jnp.float32)

    out, new_hidden = decoder_forward(packed, X, hidden)
    out = jax.block_until_ready(out)
    new_hidden = jax.block_until_ready(new_hidden)

    ref_out, ref_h = _reference_forward(params, X, hidden)
    assert out.shape == (batch, 1, n_features)
    assert new_hidden.shape == (1, batch, hidden_dim)
    assert jnp.allclose(out, ref_out, atol=1e-5, rtol=1e-5)
    assert jnp.allclose(new_hidden, ref_h, atol=1e-5, rtol=1e-5)

    print("KERNEL_OK")
</pallas_src>

<mosaic_0001>
module attributes {stable_mosaic.version = 11 : i64} {
  func.func @_decoder_kernel(%arg0: memref<64x4xf32, #tpu.memory_space<vmem>>, %arg1: memref<8x128xf32, #tpu.memory_space<vmem>>, %arg2: memref<4x384xf32, #tpu.memory_space<vmem>>, %arg3: memref<128x384xf32, #tpu.memory_space<vmem>>, %arg4: memref<1x384xf32, #tpu.memory_space<vmem>>, %arg5: memref<1x128xf32, #tpu.memory_space<vmem>>, %arg6: memref<128x128xf32, #tpu.memory_space<vmem>>, %arg7: memref<1x128xf32, #tpu.memory_space<vmem>>, %arg8: memref<8x128xf32, #tpu.memory_space<vmem>>, %arg9: memref<8x128xf32, #tpu.memory_space<vmem>>, %arg10: memref<64x384xf32, #tpu.memory_space<vmem>>) attributes {dimension_semantics = [], scalar_prefetch = 0 : i64, scratch_operands = 1 : i64, tpu.core_type = #tpu.core_type<tc>} {
    %c0 = arith.constant 0 : index
    %c0_0 = arith.constant 0 : index
    %0 = vector.load %arg0[%c0, %c0_0] : memref<64x4xf32, #tpu.memory_space<vmem>>, vector<64x4xf32>
    %c0_1 = arith.constant 0 : index
    %c0_2 = arith.constant 0 : index
    %1 = vector.load %arg2[%c0_1, %c0_2] : memref<4x384xf32, #tpu.memory_space<vmem>>, vector<4x384xf32>
    %cst = arith.constant dense<0.000000e+00> : vector<64x384xf32>
    %2 = tpu.matmul %0, %1, %cst {dimension_numbers = #tpu.dot_dimension_numbers<[1], [0], [0], [1], [0, 0, 1, 1], [], []>} : vector<64x4xf32>, vector<4x384xf32>, vector<64x384xf32> -> vector<64x384xf32>
    %c0_3 = arith.constant 0 : index
    %c0_4 = arith.constant 0 : index
    %3 = vector.load %arg4[%c0_3, %c0_4] : memref<1x384xf32, #tpu.memory_space<vmem>>, vector<1x384xf32>
    %4 = vector.broadcast %3 : vector<1x384xf32> to vector<64x384xf32>
    %5 = arith.addf %2, %4 : vector<64x384xf32>
    %c0_5 = arith.constant 0 : index
    %c0_6 = arith.constant 0 : index
    %6 = vector.load %arg10[%c0_5, %c0_6] : memref<64x384xf32, #tpu.memory_space<vmem>>, vector<64x384xf32>
    tpu.vector_store %arg10[%c0_5, %c0_6], %5 {strides = array<i32>} : memref<64x384xf32, #tpu.memory_space<vmem>>, vector<64x384xf32>,
    %c0_7 = arith.constant 0 : index
    %c0_8 = arith.constant 0 : index
    %7 = vector.load %arg5[%c0_7, %c0_8] : memref<1x128xf32, #tpu.memory_space<vmem>>, vector<1x128xf32>
    %8 = vector.shape_cast %7 : vector<1x128xf32> to vector<1x128xf32>
    %9 = vector.broadcast %8 : vector<1x128xf32> to vector<8x128xf32>
    %c0_9 = arith.constant 0 : index
    %c0_10 = arith.constant 0 : index
    %10 = vector.load %arg1[%c0_9, %c0_10] : memref<8x128xf32, #tpu.memory_space<vmem>>, vector<8x128xf32>
    %c0_11 = arith.constant 0 : index
    %c0_12 = arith.constant 0 : index
    %11 = vector.load %arg3[%c0_11, %c0_12] : memref<128x384xf32, #tpu.memory_space<vmem>>, vector<128x384xf32>
    %cst_13 = arith.constant dense<0.000000e+00> : vector<8x384xf32>
    %12 = tpu.matmul %10, %11, %cst_13 {dimension_numbers = #tpu.dot_dimension_numbers<[1], [0], [0], [1], [0, 0, 1, 1], [], []>} : vector<8x128xf32>, vector<128x384xf32>, vector<8x384xf32> -> vector<8x384xf32>
    %c0_14 = arith.constant 0 : index
    %c0_15 = arith.constant 0 : index
    %13 = vector.load %arg10[%c0_14, %c0_15] : memref<64x384xf32, #tpu.memory_space<vmem>>, vector<8x384xf32>
    %14 = vector.extract_strided_slice %13 {offsets = [0, 0], sizes = [8, 128], strides = [1, 1]} : vector<8x384xf32> to vector<8x128xf32>
    %15 = vector.extract_strided_slice %12 {offsets = [0, 0], sizes = [8, 128], strides = [1, 1]} : vector<8x384xf32> to vector<8x128xf32>
    %16 = arith.addf %14, %15 : vector<8x128xf32>
    %17 = arith.negf %16 : vector<8x128xf32>
    %18 = math.exp %17 : vector<8x128xf32>
    %cst_16 = arith.constant 1.000000e+00 : f32
    %19 = vector.broadcast %cst_16 : f32 to vector<8x128xf32>
    %20 = arith.addf %19, %18 : vector<8x128xf32>
    %21 = arith.divf %19, %20 : vector<8x128xf32>
    %22 = vector.extract_strided_slice %13 {offsets = [0, 128], sizes = [8, 128], strides = [1, 1]} : vector<8x384xf32> to vector<8x128xf32>
    %23 = vector.extract_strided_slice %12 {offsets = [0, 128], sizes = [8, 128], strides = [1, 1]} : vector<8x384xf32> to vector<8x128xf32>
    %24 = arith.addf %22, %23 : vector<8x128xf32>
    %25 = arith.negf %24 : vector<8x128xf32>
    %26 = math.exp %25 : vector<8x128xf32>
    %cst_17 = arith.constant 1.000000e+00 : f32
    %27 = vector.broadcast %cst_17 : f32 to vector<8x128xf32>
    %28 = arith.addf %27, %26 : vector<8x128xf32>
    %29 = arith.divf %27, %28 : vector<8x128xf32>
    %30 = vector.extract_strided_slice %13 {offsets = [0, 256], sizes = [8, 128], strides = [1, 1]} : vector<8x384xf32> to vector<8x128xf32>
    %31 = vector.extract_strided_slice %12 {offsets = [0, 256], sizes = [8, 128], strides = [1, 1]} : vector<8x384xf32> to vector<8x128xf32>
    %32 = arith.addf %31, %9 : vector<8x128xf32>
    %33 = arith.mulf %21, %32 : vector<8x128xf32>
    %34 = arith.addf %30, %33 : vector<8x128xf32>
    %35 = math.tanh %34 : vector<8x128xf32>
    %cst_18 = arith.constant 1.000000e+00 : f32
    %36 = vector.broadcast %cst_18 : f32 to vector<8x128xf32>
    %37 = arith.subf %36, %29 : vector<8x128xf32>
    %38 = arith.mulf %37, %35 : vector<8x128xf32>
    %39 = arith.mulf %29, %10 : vector<8x128xf32>
    %40 = arith.addf %38, %39 : vector<8x128xf32>
    %c0_19 = arith.constant 0 : index
    %c0_20 = arith.constant 0 : index
    %41 = vector.load %arg3[%c0_19, %c0_20] : memref<128x384xf32, #tpu.memory_space<vmem>>, vector<128x384xf32>
    %cst_21 = arith.constant dense<0.000000e+00> : vector<8x384xf32>
    %42 = tpu.matmul %40, %41, %cst_21 {dimension_numbers = #tpu.dot_dimension_numbers<[1], [0], [0], [1], [0, 0, 1, 1], [], []>} : vector<8x128xf32>, vector<128x384xf32>, vector<8x384xf32> -> vector<8x384xf32>
    %c8 = arith.constant 8 : index
    %c0_22 = arith.constant 0 : index
    %43 = vector.load %arg10[%c8, %c0_22] : memref<64x384xf32, #tpu.memory_space<vmem>>, vector<8x384xf32>
    %44 = vector.extract_strided_slice %43 {offsets = [0, 0], sizes = [8, 128], strides = [1, 1]} : vector<8x384xf32> to vector<8x128xf32>
    %45 = vector.extract_strided_slice %42 {offsets = [0, 0], sizes = [8, 128], strides = [1, 1]} : vector<8x384xf32> to vector<8x128xf32>
    %46 = arith.addf %44, %45 : vector<8x128xf32>
    %47 = arith.negf %46 : vector<8x128xf32>
    %48 = math.exp %47 : vector<8x128xf32>
    %cst_23 = arith.constant 1.000000e+00 : f32
    %49 = vector.broadcast %cst_23 : f32 to vector<8x128xf32>
    %50 = arith.addf %49, %48 : vector<8x128xf32>
    %51 = arith.divf %49, %50 : vector<8x128xf32>
    %52 = vector.extract_strided_slice %43 {offsets = [0, 128], sizes = [8, 128], strides = [1, 1]} : vector<8x384xf32> to vector<8x128xf32>
    %53 = vector.extract_strided_slice %42 {offsets = [0, 128], sizes = [8, 128], strides = [1, 1]} : vector<8x384xf32> to vector<8x128xf32>
    %54 = arith.addf %52, %53 : vector<8x128xf32>
    %55 = arith.negf %54 : vector<8x128xf32>
    %56 = math.exp %55 : vector<8x128xf32>
    %cst_24 = arith.constant 1.000000e+00 : f32
    %57 = vector.broadcast %cst_24 : f32 to vector<8x128xf32>
    %58 = arith.addf %57, %56 : vector<8x128xf32>
    %59 = arith.divf %57, %58 : vector<8x128xf32>
    %60 = vector.extract_strided_slice %43 {offsets = [0, 256], sizes = [8, 128], strides = [1, 1]} : vector<8x384xf32> to vector<8x128xf32>
    %61 = vector.extract_strided_slice %42 {offsets = [0, 256], sizes = [8, 128], strides = [1, 1]} : vector<8x384xf32> to vector<8x128xf32>
    %62 = arith.addf %61, %9 : vector<8x128xf32>
    %63 = arith.mulf %51, %62 : vector<8x128xf32>
    %64 = arith.addf %60, %63 : vector<8x128xf32>
    %65 = math.tanh %64 : vector<8x128xf32>
    %cst_25 = arith.constant 1.000000e+00 : f32
    %66 = vector.broadcast %cst_25 : f32 to vector<8x128xf32>
    %67 = arith.subf %66, %59 : vector<8x128xf32>
    %68 = arith.mulf %67, %65 : vector<8x128xf32>
    %69 = arith.mulf %59, %40 : vector<8x128xf32>
    %70 = arith.addf %68, %69 : vector<8x128xf32>
    %c0_26 = arith.constant 0 : index
    %c0_27 = arith.constant 0 : index
    %71 = vector.load %arg3[%c0_26, %c0_27] : memref<128x384xf32, #tpu.memory_space<vmem>>, vector<128x384xf32>
    %cst_28 = arith.constant dense<0.000000e+00> : vector<8x384xf32>
    %72 = tpu.matmul %70, %71, %cst_28 {dimension_numbers = #tpu.dot_dimension_numbers<[1], [0], [0], [1], [0, 0, 1, 1], [], []>} : vector<8x128xf32>, vector<128x384xf32>, vector<8x384xf32> -> vector<8x384xf32>
    %c16 = arith.constant 16 : index
    %c0_29 = arith.constant 0 : index
    %73 = vector.load %arg10[%c16, %c0_29] : memref<64x384xf32, #tpu.memory_space<vmem>>, vector<8x384xf32>
    %74 = vector.extract_strided_slice %73 {offsets = [0, 0], sizes = [8, 128], strides = [1, 1]} : vector<8x384xf32> to vector<8x128xf32>
    %75 = vector.extract_strided_slice %72 {offsets = [0, 0], sizes = [8, 128], strides = [1, 1]} : vector<8x384xf32> to vector<8x128xf32>
    %76 = arith.addf %74, %75 : vector<8x128xf32>
    %77 = arith.negf %76 : vector<8x128xf32>
    %78 = math.exp %77 : vector<8x128xf32>
    %cst_30 = arith.constant 1.000000e+00 : f32
    %79 = vector.broadcast %cst_30 : f32 to vector<8x128xf32>
    %80 = arith.addf %79, %78 : vector<8x128xf32>
    %81 = arith.divf %79, %80 : vector<8x128xf32>
    %82 = vector.extract_strided_slice %73 {offsets = [0, 128], sizes = [8, 128], strides = [1, 1]} : vector<8x384xf32> to vector<8x128xf32>
    %83 = vector.extract_strided_slice %72 {offsets = [0, 128], sizes = [8, 128], strides = [1, 1]} : vector<8x384xf32> to vector<8x128xf32>
    %84 = arith.addf %82, %83 : vector<8x128xf32>
    %85 = arith.negf %84 : vector<8x128xf32>
    %86 = math.exp %85 : vector<8x128xf32>
    %cst_31 = arith.constant 1.000000e+00 : f32
    %87 = vector.broadcast %cst_31 : f32 to vector<8x128xf32>
    %88 = arith.addf %87, %86 : vector<8x128xf32>
    %89 = arith.divf %87, %88 : vector<8x128xf32>
    %90 = vector.extract_strided_slice %73 {offsets = [0, 256], sizes = [8, 128], strides = [1, 1]} : vector<8x384xf32> to vector<8x128xf32>
    %91 = vector.extract_strided_slice %72 {offsets = [0, 256], sizes = [8, 128], strides = [1, 1]} : vector<8x384xf32> to vector<8x128xf32>
    %92 = arith.addf %91, %9 : vector<8x128xf32>
    %93 = arith.mulf %81, %92 : vector<8x128xf32>
    %94 = arith.addf %90, %93 : vector<8x128xf32>
    %95 = math.tanh %94 : vector<8x128xf32>
    %cst_32 = arith.constant 1.000000e+00 : f32
    %96 = vector.broadcast %cst_32 : f32 to vector<8x128xf32>
    %97 = arith.subf %96, %89 : vector<8x128xf32>
    %98 = arith.mulf %97, %95 : vector<8x128xf32>
    %99 = arith.mulf %89, %70 : vector<8x128xf32>
    %100 = arith.addf %98, %99 : vector<8x128xf32>
    %c0_33 = arith.constant 0 : index
    %c0_34 = arith.constant 0 : index
    %101 = vector.load %arg3[%c0_33, %c0_34] : memref<128x384xf32, #tpu.memory_space<vmem>>, vector<128x384xf32>
    %cst_35 = arith.constant dense<0.000000e+00> : vector<8x384xf32>
    %102 = tpu.matmul %100, %101, %cst_35 {dimension_numbers = #tpu.dot_dimension_numbers<[1], [0], [0], [1], [0, 0, 1, 1], [], []>} : vector<8x128xf32>, vector<128x384xf32>, vector<8x384xf32> -> vector<8x384xf32>
    %c24 = arith.constant 24 : index
    %c0_36 = arith.constant 0 : index
    %103 = vector.load %arg10[%c24, %c0_36] : memref<64x384xf32, #tpu.memory_space<vmem>>, vector<8x384xf32>
    %104 = vector.extract_strided_slice %103 {offsets = [0, 0], sizes = [8, 128], strides = [1, 1]} : vector<8x384xf32> to vector<8x128xf32>
    %105 = vector.extract_strided_slice %102 {offsets = [0, 0], sizes = [8, 128], strides = [1, 1]} : vector<8x384xf32> to vector<8x128xf32>
    %106 = arith.addf %104, %105 : vector<8x128xf32>
    %107 = arith.negf %106 : vector<8x128xf32>
    %108 = math.exp %107 : vector<8x128xf32>
    %cst_37 = arith.constant 1.000000e+00 : f32
    %109 = vector.broadcast %cst_37 : f32 to vector<8x128xf32>
    %110 = arith.addf %109, %108 : vector<8x128xf32>
    %111 = arith.divf %109, %110 : vector<8x128xf32>
    %112 = vector.extract_strided_slice %103 {offsets = [0, 128], sizes = [8, 128], strides = [1, 1]} : vector<8x384xf32> to vector<8x128xf32>
    %113 = vector.extract_strided_slice %102 {offsets = [0, 128], sizes = [8, 128], strides = [1, 1]} : vector<8x384xf32> to vector<8x128xf32>
    %114 = arith.addf %112, %113 : vector<8x128xf32>
    %115 = arith.negf %114 : vector<8x128xf32>
    %116 = math.exp %115 : vector<8x128xf32>
    %cst_38 = arith.constant 1.000000e+00 : f32
    %117 = vector.broadcast %cst_38 : f32 to vector<8x128xf32>
    %118 = arith.addf %117, %116 : vector<8x128xf32>
    %119 = arith.divf %117, %118 : vector<8x128xf32>
    %120 = vector.extract_strided_slice %103 {offsets = [0, 256], sizes = [8, 128], strides = [1, 1]} : vector<8x384xf32> to vector<8x128xf32>
    %121 = vector.extract_strided_slice %102 {offsets = [0, 256], sizes = [8, 128], strides = [1, 1]} : vector<8x384xf32> to vector<8x128xf32>
    %122 = arith.addf %121, %9 : vector<8x128xf32>
    %123 = arith.mulf %111, %122 : vector<8x128xf32>
    %124 = arith.addf %120, %123 : vector<8x128xf32>
    %125 = math.tanh %124 : vector<8x128xf32>
    %cst_39 = arith.constant 1.000000e+00 : f32
    %126 = vector.broadcast %cst_39 : f32 to vector<8x128xf32>
    %127 = arith.subf %126, %119 : vector<8x128xf32>
    %128 = arith.mulf %127, %125 : vector<8x128xf32>
    %129 = arith.mulf %119, %100 : vector<8x128xf32>
    %130 = arith.addf %128, %129 : vector<8x128xf32>
    %c0_40 = arith.constant 0 : index
    %c0_41 = arith.constant 0 : index
    %131 = vector.load %arg3[%c0_40, %c0_41] : memref<128x384xf32, #tpu.memory_space<vmem>>, vector<128x384xf32>
    %cst_42 = arith.constant dense<0.000000e+00> : vector<8x384xf32>
    %132 = tpu.matmul %130, %131, %cst_42 {dimension_numbers = #tpu.dot_dimension_numbers<[1], [0], [0], [1], [0, 0, 1, 1], [], []>} : vector<8x128xf32>, vector<128x384xf32>, vector<8x384xf32> -> vector<8x384xf32>
    %c32 = arith.constant 32 : index
    %c0_43 = arith.constant 0 : index
    %133 = vector.load %arg10[%c32, %c0_43] : memref<64x384xf32, #tpu.memory_space<vmem>>, vector<8x384xf32>
    %134 = vector.extract_strided_slice %133 {offsets = [0, 0], sizes = [8, 128], strides = [1, 1]} : vector<8x384xf32> to vector<8x128xf32>
    %135 = vector.extract_strided_slice %132 {offsets = [0, 0], sizes = [8, 128], strides = [1, 1]} : vector<8x384xf32> to vector<8x128xf32>
    %136 = arith.addf %134, %135 : vector<8x128xf32>
    %137 = arith.negf %136 : vector<8x128xf32>
    %138 = math.exp %137 : vector<8x128xf32>
    %cst_44 = arith.constant 1.000000e+00 : f32
    %139 = vector.broadcast %cst_44 : f32 to vector<8x128xf32>
    %140 = arith.addf %139, %138 : vector<8x128xf32>
    %141 = arith.divf %139, %140 : vector<8x128xf32>
    %142 = vector.extract_strided_slice %133 {offsets = [0, 128], sizes = [8, 128], strides = [1, 1]} : vector<8x384xf32> to vector<8x128xf32>
    %143 = vector.extract_strided_slice %132 {offsets = [0, 128], sizes = [8, 128], strides = [1, 1]} : vector<8x384xf32> to vector<8x128xf32>
    %144 = arith.addf %142, %143 : vector<8x128xf32>
    %145 = arith.negf %144 : vector<8x128xf32>
    %146 = math.exp %145 : vector<8x128xf32>
    %cst_45 = arith.constant 1.000000e+00 : f32
    %147 = vector.broadcast %cst_45 : f32 to vector<8x128xf32>
    %148 = arith.addf %147, %146 : vector<8x128xf32>
    %149 = arith.divf %147, %148 : vector<8x128xf32>
    %150 = vector.extract_strided_slice %133 {offsets = [0, 256], sizes = [8, 128], strides = [1, 1]} : vector<8x384xf32> to vector<8x128xf32>
    %151 = vector.extract_strided_slice %132 {offsets = [0, 256], sizes = [8, 128], strides = [1, 1]} : vector<8x384xf32> to vector<8x128xf32>
    %152 = arith.addf %151, %9 : vector<8x128xf32>
    %153 = arith.mulf %141, %152 : vector<8x128xf32>
    %154 = arith.addf %150, %153 : vector<8x128xf32>
    %155 = math.tanh %154 : vector<8x128xf32>
    %cst_46 = arith.constant 1.000000e+00 : f32
    %156 = vector.broadcast %cst_46 : f32 to vector<8x128xf32>
    %157 = arith.subf %156, %149 : vector<8x128xf32>
    %158 = arith.mulf %157, %155 : vector<8x128xf32>
    %159 = arith.mulf %149, %130 : vector<8x128xf32>
    %160 = arith.addf %158, %159 : vector<8x128xf32>
    %c0_47 = arith.constant 0 : index
    %c0_48 = arith.constant 0 : index
    %161 = vector.load %arg3[%c0_47, %c0_48] : memref<128x384xf32, #tpu.memory_space<vmem>>, vector<128x384xf32>
    %cst_49 = arith.constant dense<0.000000e+00> : vector<8x384xf32>
    %162 = tpu.matmul %160, %161, %cst_49 {dimension_numbers = #tpu.dot_dimension_numbers<[1], [0], [0], [1], [0, 0, 1, 1], [], []>} : vector<8x128xf32>, vector<128x384xf32>, vector<8x384xf32> -> vector<8x384xf32>
    %c40 = arith.constant 40 : index
    %c0_50 = arith.constant 0 : index
    %163 = vector.load %arg10[%c40, %c0_50] : memref<64x384xf32, #tpu.memory_space<vmem>>, vector<8x384xf32>
    %164 = vector.extract_strided_slice %163 {offsets = [0, 0], sizes = [8, 128], strides = [1, 1]} : vector<8x384xf32> to vector<8x128xf32>
    %165 = vector.extract_strided_slice %162 {offsets = [0, 0], sizes = [8, 128], strides = [1, 1]} : vector<8x384xf32> to vector<8x128xf32>
    %166 = arith.addf %164, %165 : vector<8x128xf32>
    %167 = arith.negf %166 : vector<8x128xf32>
    %168 = math.exp %167 : vector<8x128xf32>
    %cst_51 = arith.constant 1.000000e+00 : f32
    %169 = vector.broadcast %cst_51 : f32 to vector<8x128xf32>
    %170 = arith.addf %169, %168 : vector<8x128xf32>
    %171 = arith.divf %169, %170 : vector<8x128xf32>
    %172 = vector.extract_strided_slice %163 {offsets = [0, 128], sizes = [8, 128], strides = [1, 1]} : vector<8x384xf32> to vector<8x128xf32>
    %173 = vector.extract_strided_slice %162 {offsets = [0, 128], sizes = [8, 128], strides = [1, 1]} : vector<8x384xf32> to vector<8x128xf32>
    %174 = arith.addf %172, %173 : vector<8x128xf32>
    %175 = arith.negf %174 : vector<8x128xf32>
    %176 = math.exp %175 : vector<8x128xf32>
    %cst_52 = arith.constant 1.000000e+00 : f32
    %177 = vector.broadcast %cst_52 : f32 to vector<8x128xf32>
    %178 = arith.addf %177, %176 : vector<8x128xf32>
    %179 = arith.divf %177, %178 : vector<8x128xf32>
    %180 = vector.extract_strided_slice %163 {offsets = [0, 256], sizes = [8, 128], strides = [1, 1]} : vector<8x384xf32> to vector<8x128xf32>
    %181 = vector.extract_strided_slice %162 {offsets = [0, 256], sizes = [8, 128], strides = [1, 1]} : vector<8x384xf32> to vector<8x128xf32>
    %182 = arith.addf %181, %9 : vector<8x128xf32>
    %183 = arith.mulf %171, %182 : vector<8x128xf32>
    %184 = arith.addf %180, %183 : vector<8x128xf32>
    %185 = math.tanh %184 : vector<8x128xf32>
    %cst_53 = arith.constant 1.000000e+00 : f32
    %186 = vector.broadcast %cst_53 : f32 to vector<8x128xf32>
    %187 = arith.subf %186, %179 : vector<8x128xf32>
    %188 = arith.mulf %187, %185 : vector<8x128xf32>
    %189 = arith.mulf %179, %160 : vector<8x128xf32>
    %190 = arith.addf %188, %189 : vector<8x128xf32>
    %c0_54 = arith.constant 0 : index
    %c0_55 = arith.constant 0 : index
    %191 = vector.load %arg3[%c0_54, %c0_55] : memref<128x384xf32, #tpu.memory_space<vmem>>, vector<128x384xf32>
    %cst_56 = arith.constant dense<0.000000e+00> : vector<8x384xf32>
    %192 = tpu.matmul %190, %191, %cst_56 {dimension_numbers = #tpu.dot_dimension_numbers<[1], [0], [0], [1], [0, 0, 1, 1], [], []>} : vector<8x128xf32>, vector<128x384xf32>, vector<8x384xf32> -> vector<8x384xf32>
    %c48 = arith.constant 48 : index
    %c0_57 = arith.constant 0 : index
    %193 = vector.load %arg10[%c48, %c0_57] : memref<64x384xf32, #tpu.memory_space<vmem>>, vector<8x384xf32>
    %194 = vector.extract_strided_slice %193 {offsets = [0, 0], sizes = [8, 128], strides = [1, 1]} : vector<8x384xf32> to vector<8x128xf32>
    %195 = vector.extract_strided_slice %192 {offsets = [0, 0], sizes = [8, 128], strides = [1, 1]} : vector<8x384xf32> to vector<8x128xf32>
    %196 = arith.addf %194, %195 : vector<8x128xf32>
    %197 = arith.negf %196 : vector<8x128xf32>
    %198 = math.exp %197 : vector<8x128xf32>
    %cst_58 = arith.constant 1.000000e+00 : f32
    %199 = vector.broadcast %cst_58 : f32 to vector<8x128xf32>
    %200 = arith.addf %199, %198 : vector<8x128xf32>
    %201 = arith.divf %199, %200 : vector<8x128xf32>
    %202 = vector.extract_strided_slice %193 {offsets = [0, 128], sizes = [8, 128], strides = [1, 1]} : vector<8x384xf32> to vector<8x128xf32>
    %203 = vector.extract_strided_slice %192 {offsets = [0, 128], sizes = [8, 128], strides = [1, 1]} : vector<8x384xf32> to vector<8x128xf32>
    %204 = arith.addf %202, %203 : vector<8x128xf32>
    %205 = arith.negf %204 : vector<8x128xf32>
    %206 = math.exp %205 : vector<8x128xf32>
    %cst_59 = arith.constant 1.000000e+00 : f32
    %207 = vector.broadcast %cst_59 : f32 to vector<8x128xf32>
    %208 = arith.addf %207, %206 : vector<8x128xf32>
    %209 = arith.divf %207, %208 : vector<8x128xf32>
    %210 = vector.extract_strided_slice %193 {offsets = [0, 256], sizes = [8, 128], strides = [1, 1]} : vector<8x384xf32> to vector<8x128xf32>
    %211 = vector.extract_strided_slice %192 {offsets = [0, 256], sizes = [8, 128], strides = [1, 1]} : vector<8x384xf32> to vector<8x128xf32>
    %212 = arith.addf %211, %9 : vector<8x128xf32>
    %213 = arith.mulf %201, %212 : vector<8x128xf32>
    %214 = arith.addf %210, %213 : vector<8x128xf32>
    %215 = math.tanh %214 : vector<8x128xf32>
    %cst_60 = arith.constant 1.000000e+00 : f32
    %216 = vector.broadcast %cst_60 : f32 to vector<8x128xf32>
    %217 = arith.subf %216, %209 : vector<8x128xf32>
    %218 = arith.mulf %217, %215 : vector<8x128xf32>
    %219 = arith.mulf %209, %190 : vector<8x128xf32>
    %220 = arith.addf %218, %219 : vector<8x128xf32>
    %c0_61 = arith.constant 0 : index
    %c0_62 = arith.constant 0 : index
    %221 = vector.load %arg3[%c0_61, %c0_62] : memref<128x384xf32, #tpu.memory_space<vmem>>, vector<128x384xf32>
    %cst_63 = arith.constant dense<0.000000e+00> : vector<8x384xf32>
    %222 = tpu.matmul %220, %221, %cst_63 {dimension_numbers = #tpu.dot_dimension_numbers<[1], [0], [0], [1], [0, 0, 1, 1], [], []>} : vector<8x128xf32>, vector<128x384xf32>, vector<8x384xf32> -> vector<8x384xf32>
    %c56 = arith.constant 56 : index
    %c0_64 = arith.constant 0 : index
    %223 = vector.load %arg10[%c56, %c0_64] : memref<64x384xf32, #tpu.memory_space<vmem>>, vector<8x384xf32>
    %224 = vector.extract_strided_slice %223 {offsets = [0, 0], sizes = [8, 128], strides = [1, 1]} : vector<8x384xf32> to vector<8x128xf32>
    %225 = vector.extract_strided_slice %222 {offsets = [0, 0], sizes = [8, 128], strides = [1, 1]} : vector<8x384xf32> to vector<8x128xf32>
    %226 = arith.addf %224, %225 : vector<8x128xf32>
    %227 = arith.negf %226 : vector<8x128xf32>
    %228 = math.exp %227 : vector<8x128xf32>
    %cst_65 = arith.constant 1.000000e+00 : f32
    %229 = vector.broadcast %cst_65 : f32 to vector<8x128xf32>
    %230 = arith.addf %229, %228 : vector<8x128xf32>
    %231 = arith.divf %229, %230 : vector<8x128xf32>
    %232 = vector.extract_strided_slice %223 {offsets = [0, 128], sizes = [8, 128], strides = [1, 1]} : vector<8x384xf32> to vector<8x128xf32>
    %233 = vector.extract_strided_slice %222 {offsets = [0, 128], sizes = [8, 128], strides = [1, 1]} : vector<8x384xf32> to vector<8x128xf32>
    %234 = arith.addf %232, %233 : vector<8x128xf32>
    %235 = arith.negf %234 : vector<8x128xf32>
    %236 = math.exp %235 : vector<8x128xf32>
    %cst_66 = arith.constant 1.000000e+00 : f32
    %237 = vector.broadcast %cst_66 : f32 to vector<8x128xf32>
    %238 = arith.addf %237, %236 : vector<8x128xf32>
    %239 = arith.divf %237, %238 : vector<8x128xf32>
    %240 = vector.extract_strided_slice %223 {offsets = [0, 256], sizes = [8, 128], strides = [1, 1]} : vector<8x384xf32> to vector<8x128xf32>
    %241 = vector.extract_strided_slice %222 {offsets = [0, 256], sizes = [8, 128], strides = [1, 1]} : vector<8x384xf32> to vector<8x128xf32>
    %242 = arith.addf %241, %9 : vector<8x128xf32>
    %243 = arith.mulf %231, %242 : vector<8x128xf32>
    %244 = arith.addf %240, %243 : vector<8x128xf32>
    %245 = math.tanh %244 : vector<8x128xf32>
    %cst_67 = arith.constant 1.000000e+00 : f32
    %246 = vector.broadcast %cst_67 : f32 to vector<8x128xf32>
    %247 = arith.subf %246, %239 : vector<8x128xf32>
    %248 = arith.mulf %247, %245 : vector<8x128xf32>
    %249 = arith.mulf %239, %220 : vector<8x128xf32>
    %250 = arith.addf %248, %249 : vector<8x128xf32>
    %c0_68 = arith.constant 0 : index
    %c0_69 = arith.constant 0 : index
    %251 = vector.load %arg9[%c0_68, %c0_69] : memref<8x128xf32, #tpu.memory_space<vmem>>, vector<8x128xf32>
    tpu.vector_store %arg9[%c0_68, %c0_69], %250 {strides = array<i32>} : memref<8x128xf32, #tpu.memory_space<vmem>>, vector<8x128xf32>,
    %c0_70 = arith.constant 0 : index
    %c0_71 = arith.constant 0 : index
    %252 = vector.load %arg6[%c0_70, %c0_71] : memref<128x128xf32, #tpu.memory_space<vmem>>, vector<128x128xf32>
    %cst_72 = arith.constant dense<0.000000e+00> : vector<8x128xf32>
    %253 = tpu.matmul %250, %252, %cst_72 {dimension_numbers = #tpu.dot_dimension_numbers<[1], [0], [0], [1], [0, 0, 1, 1], [], []>} : vector<8x128xf32>, vector<128x128xf32>, vector<8x128xf32> -> vector<8x128xf32>
    %c0_73 = arith.constant 0 : index
    %c0_74 = arith.constant 0 : index
    %254 = vector.load %arg7[%c0_73, %c0_74] : memref<1x128xf32, #tpu.memory_space<vmem>>, vector<1x128xf32>
    %255 = vector.broadcast %254 : vector<1x128xf32> to vector<8x128xf32>
    %256 = arith.addf %253, %255 : vector<8x128xf32>
    %c0_75 = arith.constant 0 : index
    %c0_76 = arith.constant 0 : index
    %257 = vector.load %arg8[%c0_75, %c0_76] : memref<8x128xf32, #tpu.memory_space<vmem>>, vector<8x128xf32>
    tpu.vector_store %arg8[%c0_75, %c0_76], %256 {strides = array<i32>} : memref<8x128xf32, #tpu.memory_space<vmem>>, vector<8x128xf32>,
    return
  }
}

</mosaic_0001>

<bundles_post_ra>
// kernel: decoder_forward.1
= control target key start
LH: loop header
LB: loop body
LE: loop exit
PB: predicated region body
PF: predicated region fallthrough
CT: control target
= control target key end

     0   :  { %15 = vsyncpa [#allocation4], 0  ;;  %s3670_s0 = inlined_call_operand.vmem [shape: f32[64,4], index: 0, kind: input, shape index: {}]   ;;  %s3671_s1 = inlined_call_operand.vmem [shape: f32[8,128], index: 1, kind: input, shape index: {}, may-alias: {1,9}]   ;;  %s3672_s2 = inlined_call_operand.vmem [shape: f32[4,384], index: 2, kind: input, shape index: {}]   ;;  %s3673_s3 = inlined_call_operand.hbm [shape: f32[128,384], index: 3, kind: input, shape index: {}]   ;;  %s3674_s4 = inlined_call_operand.hbm [shape: f32[1,384], index: 4, kind: input, shape index: {}]   ;;  %s3675_s5 = inlined_call_operand.vmem [shape: f32[1,128], index: 5, kind: input, shape index: {}]   ;;  %s3676_s6 = inlined_call_operand.vmem [shape: f32[128,128], index: 6, kind: input, shape index: {}]   ;;  %s3677_s7 = inlined_call_operand.hbm [shape: f32[1,128], index: 7, kind: input, shape index: {}]   ;;  %s3678_s8 = inlined_call_operand.vmem [shape: f32[8,128], index: 8, kind: output, shape index: {0}]   ;;  %s3679_s9 = inlined_call_operand.vmem [shape: f32[8,128], index: 9, kind: output, shape index: {1}, may-alias: {1,9}]  }
   0x1   :  { %16 = vsyncpa [#allocation6], 0  ;;  %s3052_s30 = smov [#allocation5]   ;;  %s3053_s11 = smov [#allocation3]  }
   0x2   :  { %s41_s10 = sshll.u32 %s3052_s30, 4  ;;  %s28_s12 = sshll.u32 %s3053_s11, 4  ;;  %s42_s10 = int_to_ptr.vmem [resolvable:$true] %s41_s10  ;;  %s3110_s12 = int_to_ptr.vmem [resolvable:$true] %s28_s12 }
   0x3   :  { %s2982_s15 = scalar_lea.hbm %s3674_s4, 48 }
   0x4   :  { %p2983_p0 = scmp.ne.s32.totalorder %s3674_s4, %s2982_s15  ;;  %p2986_p1 = scmp.lt.u32.totalorder %s2982_s15, %s3674_s4 }
   0x6   :  { %p2988_p2 = pnand %p2986_p1, %p2983_p0 }
   0x8   :  { %2991 = shalt.err (!%p2988_p2)
}
   0x9   :  { %s2992_s20 = scalar_lea.vmem %s42_s10, 48  ;;  %s2996_s21 = scalar_lea.vmem %s42_s10, 64 }
   0xa   :  { %p2993_p3 = scmp.ne.s32.totalorder %s42_s10, %s2992_s20  ;;  %p2997_p4 = scmp.lt.s32.totalorder %s42_s10, %s42_s10 }
   0xb   :  { %p2998_p5 = scmp.lt.s32.totalorder %s2996_s21, %s2992_s20 }
   0xd   :  { %p2999_p6 = por %p2998_p5, %p2997_p4 }
   0xf   :  { %p3000_p7 = pnand %p2999_p6, %p2993_p3 }
  0x11   :  { %3003 = shalt.err (!%p3000_p7)
}
  0x12   :  { %44 = dma.hbm_to_vmem [thread:$0]  %s3674_s4, 48, %s42_s10, [#allocation6]  }
  0x13   :  { %s3004_s26 = scalar_lea.hbm %s3673_s3, 6144 }
  0x14   :  { %p3005_p8 = scmp.ne.s32.totalorder %s3673_s3, %s3004_s26  ;;  %p3008_p9 = scmp.lt.u32.totalorder %s3004_s26, %s3673_s3 }
  0x16   :  { %p3010_p10 = pnand %p3008_p9, %p3005_p8 }
  0x18   :  { %3013 = shalt.err (!%p3010_p10)
}
  0x19   :  { %s3014_s11 = scalar_lea.vmem %s3110_s12, 6144  ;;  %p3019_p12 = scmp.lt.s32.totalorder %s3110_s12, %s3110_s12 }
  0x1a   :  { %p3015_p11 = scmp.ne.s32.totalorder %s3110_s12, %s3014_s11  ;;  %p3020_p13 = scmp.lt.s32.totalorder %s3014_s11, %s3014_s11 }
  0x1c   :  { %p3021_p0 = por %p3020_p13, %p3019_p12 }
  0x1e   :  { %p3022_p1 = pnand %p3021_p0, %p3015_p11 }
  0x20   :  { %3025 = shalt.err (!%p3022_p1)
}
  0x21   :  { %s3054_s4 = smov 384   ;;  %s3055_s10 = smov 24  }
  0x22   :  { %34 = dma.hbm_to_vmem [thread:$0]  %s3673_s3, 6144, %s3110_s12, [#allocation4], %s3054_s4, %s3054_s4, %s3055_s10  }
  0x23   :  { %s3056_s15 = smov [#allocation7]   ;;  %s3026_s19 = scalar_lea.hbm %s3677_s7, 16 }
  0x24   :  { %s55_s16 = sshll.u32 %s3056_s15, 4  ;;  %p3027_p2 = scmp.ne.s32.totalorder %s3677_s7, %s3026_s19  ;;  %s56_s16 = int_to_ptr.vmem [resolvable:$true] %s55_s16 }
  0x25   :  { %p3030_p3 = scmp.lt.u32.totalorder %s3026_s19, %s3677_s7 }
  0x27   :  { %p3032_p4 = pnand %p3030_p3, %p3027_p2 }
  0x29   :  { %3035 = shalt.err (!%p3032_p4)
}
  0x2a   :  { %s3036_s24 = scalar_lea.vmem %s56_s16, 16  ;;  %s3040_s3 = scalar_lea.vmem %s56_s16, 32 }
  0x2b   :  { %p3037_p5 = scmp.ne.s32.totalorder %s56_s16, %s3036_s24  ;;  %p3041_p6 = scmp.lt.s32.totalorder %s56_s16, %s56_s16 }
  0x2c   :  { %p3042_p7 = scmp.lt.s32.totalorder %s3040_s3, %s3036_s24 }
  0x2e   :  { %p3043_p8 = por %p3042_p7, %p3041_p6 }
  0x30   :  { %p3044_p9 = pnand %p3043_p8, %p3037_p5 }
  0x32   :  { %3047 = shalt.err (!%p3044_p9)
}
  0x33   :  { %58 = dma.hbm_to_vmem [thread:$0]  %s3677_s7, 16, %s56_s16, [#allocation6]  }
  0x34   :  { %3048 = dma.done.wait [#allocation4], 6144  }
  0x35   :  { %3049 = vsyncadd [#allocation4], 4294961152 }
  0x36   :  { %3050 = dma.done.wait [#allocation6], 64  }
  0x37   :  { %3051 = vsyncadd [#allocation6], 4294967232  ;;  %v3057_v0 = vmov 0.0   ;;  %v76_v1 = vld [vmem:[%s3672_s2] sm:$0xff]  ;;  %vm123_vm0 = vcmask 1043456   ;;  %vm98_vm1 = vcmask 31744  }
  0x38   :  { %194 = vmatprep.mubr.f32.mxu0 %v3057_v0  ;;  %v68_v2 = vld [vmem:[%s3670_s0] sm:$0xff]  ;;  %v381_v3 = vld [vmem:[#allocation3 + $0x8] sm:$0xff]  ;;  %v97_v4 = vcombine.high %v76_v1, %v76_v1  ;;  %v383_v7 = vld [vmem:[#allocation3 + $0x18] sm:$0xff]  ;;  %v3058_v34 = vmov 0.0|0.0   ;;  %vm3059_vm2 = vmmov 0  }
  0x39   :  { %v384_v5 = vld [vmem:[#allocation3 + $0x20] sm:$0xff]  ;;  %2062 = vmatprep.mubr.msk.f32.mxu1 %vm98_vm1, %v68_v2  ;;  %v387_v10 = vld [vmem:[#allocation3 + $0x38] sm:$0xff]  ;;  %v390_v11 = vld [vmem:[#allocation3 + $0x50] sm:$0xff] }
  0x3a   :  { %v380_v6 = vld [vmem:[#allocation3] sm:$0xff]  ;;  %v3161_v8 = vpack.c.bf16 %v384_v5, %v381_v3  ;;  %1861 = vmatprep.subr.msk.mxu0 %vm123_vm0, %v97_v4  ;;  %v3166_v12 = vpack.c.bf16 %v390_v11, %v387_v10  ;;  %v386_v13 = vld [vmem:[#allocation3 + $0x30] sm:$0xff]  ;;  %v389_v14 = vld [vmem:[#allocation3 + $0x48] sm:$0xff] }
  0x3b   :  { %v3163_v9 = vpack.c.bf16 %v383_v7, %v380_v6  ;;  %1862 = vmatpush1.msk.msra.mxu0 %vm123_vm0, %v76_v1  ;;  %v393_v15 = vld [vmem:[#allocation3 + $0x68] sm:$0xff]  ;;  %v396_v16 = vld [vmem:[#allocation3 + $0x80] sm:$0xff]  ;;  %v3176_v18 = vpack.c.bf16 %v389_v14, %v386_v13  ;;  %v395_v21 = vld [vmem:[#allocation3 + $0x78] sm:$0xff] }
  0x3c   :  { %1863 = vmatmul.mubr.msk.f32.vlgmr.msra.gmra.mrb[0].mxu0 %vm98_vm1, %v68_v2  ;;  %2390 = vmatprep.subr.bf16.mxu0 %v3161_v8  ;;  %v69_v17 = vld [vmem:[%s3670_s0 + $0x8] sm:$0xff]  ;;  %v3179_v19 = vpack.c.bf16 %v396_v16, %v393_v15  ;;  %v392_v20 = vld [vmem:[#allocation3 + $0x60] sm:$0xff]  ;;  %v399_v22 = vld [vmem:[#allocation3 + $0x98] sm:$0xff] }
  0x3d   :  { %2392 = vmatpush1.bf16.msra.mxu0 %v3163_v9  ;;  %200 = vmatprep.mubr.f32.mxu0 %v3057_v0  ;;  %v402_v23 = vld [vmem:[#allocation3 + $0xb0] sm:$0xff]  ;;  %v3187_v25 = vpack.c.bf16 %v395_v21, %v392_v20  ;;  %v77_v26 = vld [vmem:[%s3672_s2 + $0x8] sm:$0xf]  ;;  %v408_v31 = vld [vmem:[#allocation3 + $0xe0] sm:$0xff] }
  0x3e   :  { %2394 = vmatprep.subr.bf16.mxu0 %v3166_v12  ;;  %v70_v24 = vld [vmem:[%s3670_s0 + $0x10] sm:$0xff]  ;;  %v3193_v27 = vpack.c.bf16 %v402_v23, %v399_v22  ;;  %v401_v29 = vld [vmem:[#allocation3 + $0xa8] sm:$0xff]  ;;  %2060 = vmatprep.subr.msk.mxu1 %vm123_vm0, %v77_v26  ;;  %v71_v36 = vld [vmem:[%s3670_s0 + $0x18] sm:$0xff] }
  0x3f   :  { %v398_v28 = vld [vmem:[#allocation3 + $0x90] sm:$0xff]  ;;  %v405_v30 = vld [vmem:[#allocation3 + $0xc8] sm:$0xff]  ;;  %2061 = vmatpush3.msk.msra.mxu1 %vm123_vm0, %v77_v26  ;;  %v388_v38 = vld [vmem:[#allocation3 + $0x40] sm:$0xff] }
  0x40   :  { %1864 = vmatmul.mubr.msk.f32.gmra.mrb[2].mxu0 %vm98_vm1, %v69_v17  ;;  %v382_v32 = vld [vmem:[#allocation3 + $0x10] sm:$0xff]  ;;  %v385_v33 = vld [vmem:[#allocation3 + $0x28] sm:$0xff]  ;;  %2421 = vmatprep.subr.bf16.mxu1 %v3058_v34  ;;  %v3206_v37 = vpack.c.bf16 %v401_v29, %v398_v28  ;;  %v3209_v39 = vpack.c.bf16 %v408_v31, %v405_v30  ;;  %v404_v40 = vld [vmem:[#allocation3 + $0xc0] sm:$0xff]  ;;  %v80_v30 = vlaneseq }
  0x41   :  { %2396 = vmatpush1.bf16.msra.mxu0 %v3176_v18  ;;  %206 = vmatprep.mubr.f32.mxu0 %v3057_v0  ;;  %v3199_v35 = vpack.c.bf16 %v385_v33, %v382_v32  ;;  %v407_v41 = vld [vmem:[#allocation3 + $0xd8] sm:$0xff]  ;;  %v414_v44 = vld [vmem:[#allocation3 + $0x110] sm:$0xff]  ;;  %v397_v47 = vld [vmem:[#allocation3 + $0x88] sm:$0xff] }
  0x42   :  { %2398 = vmatprep.subr.bf16.mxu0 %v3179_v19  ;;  %2063 = vmatmul.mubr.msk.f32.vlgmr.msra.gmra.mrb[0].mxu1 %vm98_vm1, %v69_v17  ;;  %v391_v42 = vld [vmem:[#allocation3 + $0x58] sm:$0xff]  ;;  %v394_v46 = vld [vmem:[#allocation3 + $0x70] sm:$0xff]  ;;  %v72_v48 = vld [vmem:[%s3670_s0 + $0x20] sm:$0xff]  ;;  %v3223_v49 = vpack.c.bf16 %v407_v41, %v404_v40  ;;  %v81_v31 = vshrl.u32 %v80_v30, 7 }
  0x43   :  { %v411_v43 = vld [vmem:[#allocation3 + $0xf8] sm:$0xff]  ;;  %2423 = vmatpush3.bf16.msra.mxu1 %v3199_v35  ;;  %v3213_v45 = vpack.c.bf16 %v391_v42, %v388_v38  ;;  %2065 = vmatprep.mubr.msk.f32.mxu1 %vm98_vm1, %v70_v24  ;;  %v410_v51 = vld [vmem:[#allocation3 + $0xf0] sm:$0xff]  ;;  %v413_v52 = vld [vmem:[#allocation3 + $0x108] sm:$0xff]  ;;  %v3230_v55 = vpack.c.bf16 %v397_v47, %v394_v46 }
  0x44   :  { %1865 = vmatmul.mubr.msk.f32.gmra.mrb[4].mxu0 %vm98_vm1, %v70_v24  ;;  %2424 = vmatprep.subr.bf16.mxu1 %v3058_v34  ;;  %v3226_v50 = vpack.c.bf16 %v414_v44, %v411_v43  ;;  %v417_v53 = vld [vmem:[#allocation3 + $0x128] sm:$0xff]  ;;  %v420_v54 = vld [vmem:[#allocation3 + $0x140] sm:$0xff]  ;;  %v403_v57 = vld [vmem:[#allocation3 + $0xb8] sm:$0xff]  ;;  %v3240_v59 = vpack.c.bf16 %v413_v52, %v410_v51  ;;  %v90_v32 = vsub.s32 2, %v81_v31 }
  0x45   :  { %2400 = vmatpush1.bf16.msra.mxu0 %v3187_v25  ;;  %212 = vmatprep.mubr.f32.mxu0 %v3057_v0  ;;  %v400_v56 = vld [vmem:[#allocation3 + $0xa0] sm:$0xff]  ;;  %v73_v58 = vld [vmem:[%s3670_s0 + $0x28] sm:$0xff]  ;;  %v74_v60 = vld [vmem:[%s3670_s0 + $0x30] sm:$0xff]  ;;  %v3246_v61 = vpack.c.bf16 %v420_v54, %v417_v53 }
  0x46   :  { %2402 = vmatprep.subr.bf16.mxu0 %v3193_v27  ;;  %2066 = vmatmul.mubr.msk.f32.gmra.mrb[2].mxu1 %vm98_vm1, %v71_v36  ;;  %v416_v62 = vld [vmem:[#allocation3 + $0x120] sm:$0xff]  ;;  %v419_v63 = vld [vmem:[#allocation3 + $0x138] sm:$0xff]  ;;  %v426_v2 = vld [vmem:[#allocation3 + $0x170] sm:$0xff]  ;;  %v3250_v3 = vpack.c.bf16 %v403_v57, %v400_v56 }
  0x47   :  { %2426 = vmatpush3.bf16.msra.mxu1 %v3213_v45  ;;  %2068 = vmatprep.mubr.msk.f32.mxu1 %vm98_vm1, %v72_v48  ;;  %v423_v1 = vld [vmem:[#allocation3 + $0x158] sm:$0xff]  ;;  %v406_v4 = vld [vmem:[#allocation3 + $0xd0] sm:$0xff]  ;;  %v409_v5 = vld [vmem:[#allocation3 + $0xe8] sm:$0xff]  ;;  %v3257_v6 = vpack.c.bf16 %v419_v63, %v416_v62 }
  0x48   :  { %1866 = vmatmul.mubr.msk.f32.gmra.mrb[6].mxu0 %vm98_vm1, %v71_v36  ;;  %2427 = vmatprep.subr.bf16.mxu1 %v3058_v34  ;;  %v75_v7 = vld [vmem:[%s3670_s0 + $0x38] sm:$0xff]  ;;  %v3263_v10 = vpack.c.bf16 %v426_v2, %v423_v1  ;;  %v422_v11 = vld [vmem:[#allocation3 + $0x150] sm:$0xff]  ;;  %v425_v13 = vld [vmem:[#allocation3 + $0x168] sm:$0xff]  ;;  %v3267_v14 = vpack.c.bf16 %v409_v5, %v406_v4 }
  0x49   :  { %2404 = vmatpush1.bf16.msra.mxu0 %v3206_v37  ;;  %218 = vmatprep.mubr.f32.mxu0 %v3057_v0  ;;  %v412_v15 = vld [vmem:[#allocation3 + $0x100] sm:$0xff]  ;;  %v415_v16 = vld [vmem:[#allocation3 + $0x118] sm:$0xff]  ;;  %v3275_v17 = vpack.c.bf16 %v425_v13, %v422_v11  ;;  %v418_v21 = vld [vmem:[#allocation3 + $0x130] sm:$0xff] }
  0x4a   :  { %2406 = vmatprep.subr.bf16.mxu0 %v3209_v39  ;;  %2069 = vmatmul.mubr.msk.f32.gmra.mrb[4].mxu1 %vm98_vm1, %v73_v58  ;;  %v3279_v20 = vpack.c.bf16 %v415_v16, %v412_v15  ;;  %v421_v22 = vld [vmem:[#allocation3 + $0x148] sm:$0xff]  ;;  %v3288_v23 = vld [vmem:[%s3671_s1] sm:$0xff]  ;;  %v427_v28 = vld [vmem:[#allocation3 + $0x178] sm:$0xff] }
  0x4b   :  { %2429 = vmatpush3.bf16.msra.mxu1 %v3230_v55  ;;  %2071 = vmatprep.mubr.msk.f32.mxu1 %vm98_vm1, %v74_v60  ;;  %v3292_v24 = vpack.c.bf16 %v421_v22, %v418_v21  ;;  %v424_v26 = vld [vmem:[#allocation3 + $0x160] sm:$0xff] }
  0x4c   :  { %1867 = vmatmul.mubr.msk.f32.gmra.mrb[8].mxu0 %vm98_vm1, %v72_v48  ;;  %2430 = vmatprep.subr.bf16.mxu1 %v3058_v34  ;;  %v3300_v29 = vpack.c.bf16 %v427_v28, %v424_v26  ;;  %v78_v33 = vld [vmem:[#allocation5] sm:$0x7] }
  0x4d   :  { %2408 = vmatpush1.bf16.msra.mxu0 %v3223_v49  ;;  %224 = vmatprep.mubr.f32.mxu0 %v3057_v0  ;;  %v91_v36 = vrot.slane %v78_v33, %v90_v32  ;;  %v3361_v26 = vld [vmem:[%s3675_s5] ss:$0 sm:$0xff] }
  0x4e   :  { %2410 = vmatprep.subr.bf16.mxu0 %v3226_v50  ;;  %2072 = vmatmul.mubr.msk.f32.gmra.mrb[6].mxu1 %vm98_vm1, %v75_v7 }
  0x4f   :  { %2432 = vmatpush3.bf16.msra.mxu1 %v3250_v3  ;;  %2106 = vmatprep.mubr.msk.f32.mxu1 %vm3059_vm2, %v3057_v0 }
  0x50   :  { %1868 = vmatmul.mubr.msk.f32.gmra.mrb[10].mxu0 %vm98_vm1, %v73_v58  ;;  %2433 = vmatprep.subr.bf16.mxu1 %v3058_v34  ;;  %v82_v58 = vsub.s32 0, %v81_v31 }
  0x51   :  { %2412 = vmatpush1.bf16.msra.mxu0 %v3240_v59  ;;  %230 = vmatprep.mubr.f32.mxu0 %v3057_v0 }
  0x52   :  { %2414 = vmatprep.subr.bf16.mxu0 %v3246_v61  ;;  %v3352_v62 = vrot.slane %v78_v33, %v82_v58 }
  0x53   :  { %2435 = vmatpush3.bf16.msra.mxu1 %v3267_v14 }
  0x54   :  { %1869 = vmatmul.mubr.msk.f32.gmra.mrb[12].mxu0 %vm98_vm1, %v74_v60  ;;  %2436 = vmatprep.subr.bf16.mxu1 %v3058_v34  ;;  %v86_v60 = vsub.s32 1, %v81_v31 }
  0x55   :  { %2416 = vmatpush1.bf16.msra.mxu0 %v3257_v6  ;;  %236 = vmatprep.mubr.f32.mxu0 %v3057_v0 }
  0x56   :  { %2418 = vmatprep.subr.bf16.mxu0 %v3263_v10  ;;  %v3354_v1 = vrot.slane %v78_v33, %v86_v60 }
  0x57   :  { %2438 = vmatpush3.bf16.msra.mxu1 %v3279_v20 }
  0x58   :  { %1870 = vmatmul.mubr.msk.f32.gmra.mrb[14].mxu0 %vm98_vm1, %v75_v7  ;;  %2439 = vmatprep.subr.bf16.mxu1 %v3058_v34 }
  0x59   :  { %2420 = vmatpush1.bf16.msra.mxu0 %v3275_v17  ;;  %492 = vmatprep.mubr.f32.mxu0 %v3057_v0 }
  0x5a   :  { %2446 = vmatprep.subr.bf16.mxu0 %v3161_v8 }
  0x5b   :  { %2441 = vmatpush3.bf16.msra.mxu1 %v3292_v24 }
  0x5c   :  { %493 = vmatmul.mubr.f32.vlgmr.msra.gmra.mrb[0].mxu0 %v3288_v23  ;;  %2442 = vmatprep.subr.bf16.mxu1 %v3058_v34 }
  0x5d   :  { %2448 = vmatpush1.bf16.msra.mxu0 %v3163_v9  ;;  %658 = vmatprep.mubr.f32.mxu0 %v3057_v0 }
  0x5e   :  { %2450 = vmatprep.subr.bf16.mxu0 %v3166_v12 }
  0x5f   :  { %2444 = vmatpush3.bf16.msra.mxu1 %v3300_v29 }
  0x60   :  { %2477 = vmatprep.subr.bf16.mxu1 %v3058_v34 }
  0x61   :  { %2452 = vmatpush1.bf16.msra.mxu0 %v3176_v18 }
  0x62   :  { %2454 = vmatprep.subr.bf16.mxu0 %v3179_v19  ;;  %2107 = vmatmul.mubr.f32.vlgmr.msra.gmra.mrb[8].mxu1 %v3288_v23 }
  0x63   :  { %2479 = vmatpush3.bf16.msra.mxu1 %v3199_v35  ;;  %2141 = vmatprep.mubr.msk.f32.mxu1 %vm3059_vm2, %v3057_v0 }
  0x64   :  { %2480 = vmatprep.subr.bf16.mxu1 %v3058_v34 }
  0x65   :  { %2456 = vmatpush1.bf16.msra.mxu0 %v3187_v25 }
  0x66   :  { %2458 = vmatprep.subr.bf16.mxu0 %v3193_v27 }
  0x67   :  { %2482 = vmatpush3.bf16.msra.mxu1 %v3213_v45 }
  0x68   :  { %2483 = vmatprep.subr.bf16.mxu1 %v3058_v34 }
  0x69   :  { %2460 = vmatpush1.bf16.msra.mxu0 %v3206_v37 }
  0x6a   :  { %2462 = vmatprep.subr.bf16.mxu0 %v3209_v39 }
  0x6b   :  { %2485 = vmatpush3.bf16.msra.mxu1 %v3230_v55 }
  0x6c   :  { %2486 = vmatprep.subr.bf16.mxu1 %v3058_v34 }
  0x6d   :  { %2464 = vmatpush1.bf16.msra.mxu0 %v3223_v49 }
  0x6e   :  { %2466 = vmatprep.subr.bf16.mxu0 %v3226_v50 }
  0x6f   :  { %2488 = vmatpush3.bf16.msra.mxu1 %v3250_v3 }
  0x70   :  { %2489 = vmatprep.subr.bf16.mxu1 %v3058_v34 }
  0x71   :  { %2468 = vmatpush1.bf16.msra.mxu0 %v3240_v59 }
  0x72   :  { %2470 = vmatprep.subr.bf16.mxu0 %v3246_v61 }
  0x73   :  { %2491 = vmatpush3.bf16.msra.mxu1 %v3267_v14 }
  0x74   :  { %2492 = vmatprep.subr.bf16.mxu1 %v3058_v34 }
  0x75   :  { %2472 = vmatpush1.bf16.msra.mxu0 %v3257_v6 }
  0x76   :  { %2474 = vmatprep.subr.bf16.mxu0 %v3263_v10 }
  0x77   :  { %2494 = vmatpush3.bf16.msra.mxu1 %v3279_v20 }
  0x78   :  { %2495 = vmatprep.subr.bf16.mxu1 %v3058_v34 }
  0x79   :  { %2476 = vmatpush1.bf16.msra.mxu0 %v3275_v17 }
  0x7a   :  { %2502 = vmatprep.subr.bf16.mxu0 %v3161_v8 }
  0x7b   :  { %2497 = vmatpush3.bf16.msra.mxu1 %v3292_v24 }
  0x7c   :  { %2498 = vmatprep.subr.bf16.mxu1 %v3058_v34 }
  0x7f   :  { %2500 = vmatpush3.bf16.msra.mxu1 %v3300_v29 }
  0x80   :  { %2533 = vmatprep.subr.bf16.mxu1 %v3058_v34 }
 0x115   :  { %v2064_v38 = vpop.f32.mrb[0].mxu1 }
 0x116   :  { %v3338_v40 = vadd.f32 %v2064_v38, %v91_v36  ;;  %v309_v41 = vpop.f32.mrb[1].mxu1 }
 0x117   :  { %v310_v32 = vadd.f32 %v309_v41, %v91_v36 }
 0x119   :  { %v2067_v42 = vpop.f32.mrb[2].mxu1 }
 0x11a   :  { %v3340_v43 = vadd.f32 %v2067_v42, %v91_v36  ;;  %v319_v44 = vpop.f32.mrb[3].mxu1 }
 0x11b   :  { %v3342_v46 = vadd.f32 %v319_v44, %v91_v36 }
 0x11d   :  { %v2070_v47 = vpop.f32.mrb[4].mxu1 }
 0x11e   :  { %v3344_v48 = vadd.f32 %v2070_v47, %v91_v36  ;;  %v329_v51 = vpop.f32.mrb[5].mxu1 }
 0x11f   :  { %v3346_v52 = vadd.f32 %v329_v51, %v91_v36 }
 0x121   :  { %v2073_v53 = vpop.f32.mrb[6].mxu1 }
 0x122   :  { %v3348_v54 = vadd.f32 %v2073_v53, %v91_v36  ;;  %v339_v56 = vpop.f32.mrb[7].mxu1 }
 0x123   :  { %v3350_v57 = vadd.f32 %v339_v56, %v91_v36 }
 0x12f   :  { %v494_v63 = vpop.f32.mrb[0].mxu0 }
 0x130   :  { %v2861_v2 = vadd.f32 %v494_v63, %v3352_v62  ;;  %v496_v4 = vpop.f32.mrb[1].mxu0 }
 0x131   :  { %v2862_v7 = vadd.f32 %v496_v4, %v3354_v1 }
 0x132   :  { %v1881_v5 = vmul.f32 -1.442695, %v2861_v2 }
 0x133   :  { %v1882_v11 = vmul.f32 -1.442695, %v2862_v7 }
 0x134   :  { %2902 = vpow2.f32 %v1881_v5 }
 0x135   :  { %v565_v13 = vpop.f32.mrb[8].mxu1  ;;  %2904 = vpow2.f32 %v1882_v11 }
 0x136   :  { %v2108_v15 = vpop.f32.mrb[9].mxu1  ;;  %v586_v30 = vadd.f32 %v3361_v26, %v565_v13 }
 0x13e   :  { %v2903_v16 = vpop.eup %2902 }
 0x13f   :  { %v576_v21 = vadd.f32 1.0, %v2903_v16  ;;  %v2905_v22 = vpop.eup %2904 }
 0x140   :  { %v583_v28 = vadd.f32 1.0, %v2905_v22 }
 0x141   :  { %2906 = vrcp.f32 %v576_v21 }
 0x142   :  { %2908 = vrcp.f32 %v583_v28 }
 0x14b   :  { %v2907_v31 = vpop.eup %2906 }
 0x14c   :  { %v587_v33 = vmul.f32 %v2907_v31, %v586_v30  ;;  %v2909_v42 = vpop.eup %2908 }
 0x14d   :  { %v590_v44 = vsub.f32 1.0, %v2909_v42  ;;  %v592_v53 = vmul.f32 %v2909_v42, %v3288_v23 }
 0x14e   :  { %v588_v38 = vadd.f32 %v587_v33, %v310_v32 }
 0x150   :  { %2910 = vtanh.f32 %v588_v38 }
 0x15a   :  { %v2911_v47 = vpop.eup %2910 }
 0x15b   :  { %v591_v51 = vmul.f32 %v2911_v47, %v590_v44 }
 0x15d   :  { %v593_v56 = vadd.f32 %v592_v53, %v591_v51 }
 0x15f   :  { %659 = vmatmul.mubr.f32.vlgmr.msra.gmra.mrb[2].mxu0 %v593_v56  ;;  %2142 = vmatmul.mubr.f32.vlgmr.msra.gmra.mrb[10].mxu1 %v593_v56 }
 0x160   :  { %2504 = vmatpush1.bf16.msra.mxu0 %v3163_v9  ;;  %2535 = vmatpush3.bf16.msra.mxu1 %v3199_v35 }
 0x161   :  { %2506 = vmatprep.subr.bf16.mxu0 %v3166_v12  ;;  %2536 = vmatprep.subr.bf16.mxu1 %v3058_v34 }
 0x162   :  { %824 = vmatprep.mubr.f32.mxu0 %v3057_v0  ;;  %2176 = vmatprep.mubr.msk.f32.mxu1 %vm3059_vm2, %v3057_v0 }
 0x164   :  { %2508 = vmatpush1.bf16.msra.mxu0 %v3176_v18  ;;  %2538 = vmatpush3.bf16.msra.mxu1 %v3213_v45 }
 0x165   :  { %2510 = vmatprep.subr.bf16.mxu0 %v3179_v19  ;;  %2539 = vmatprep.subr.bf16.mxu1 %v3058_v34 }
 0x168   :  { %2512 = vmatpush1.bf16.msra.mxu0 %v3187_v25  ;;  %2541 = vmatpush3.bf16.msra.mxu1 %v3230_v55 }
 0x169   :  { %2514 = vmatprep.subr.bf16.mxu0 %v3193_v27  ;;  %2542 = vmatprep.subr.bf16.mxu1 %v3058_v34 }
 0x16c   :  { %2516 = vmatpush1.bf16.msra.mxu0 %v3206_v37  ;;  %2544 = vmatpush3.bf16.msra.mxu1 %v3250_v3 }
 0x16d   :  { %2518 = vmatprep.subr.bf16.mxu0 %v3209_v39  ;;  %2545 = vmatprep.subr.bf16.mxu1 %v3058_v34 }
 0x170   :  { %2520 = vmatpush1.bf16.msra.mxu0 %v3223_v49  ;;  %2547 = vmatpush3.bf16.msra.mxu1 %v3267_v14 }
 0x171   :  { %2522 = vmatprep.subr.bf16.mxu0 %v3226_v50  ;;  %2548 = vmatprep.subr.bf16.mxu1 %v3058_v34 }
 0x174   :  { %2524 = vmatpush1.bf16.msra.mxu0 %v3240_v59  ;;  %2550 = vmatpush3.bf16.msra.mxu1 %v3279_v20 }
 0x175   :  { %2526 = vmatprep.subr.bf16.mxu0 %v3246_v61  ;;  %2551 = vmatprep.subr.bf16.mxu1 %v3058_v34 }
 0x178   :  { %2528 = vmatpush1.bf16.msra.mxu0 %v3257_v6  ;;  %2553 = vmatpush3.bf16.msra.mxu1 %v3292_v24 }
 0x179   :  { %2530 = vmatprep.subr.bf16.mxu0 %v3263_v10  ;;  %2554 = vmatprep.subr.bf16.mxu1 %v3058_v34 }
 0x17c   :  { %2532 = vmatpush1.bf16.msra.mxu0 %v3275_v17  ;;  %2556 = vmatpush3.bf16.msra.mxu1 %v3300_v29 }
 0x17d   :  { %2558 = vmatprep.subr.bf16.mxu0 %v3161_v8  ;;  %2589 = vmatprep.subr.bf16.mxu1 %v3058_v34 }
 0x232   :  { %v660_v23 = vpop.f32.mrb[2].mxu0  ;;  %v731_v36 = vpop.f32.mrb[10].mxu1 }
 0x233   :  { %v2863_v41 = vadd.f32 %v660_v23, %v3352_v62  ;;  %v662_v58 = vpop.f32.mrb[3].mxu0  ;;  %v2143_v60 = vpop.f32.mrb[11].mxu1  ;;  %v752_v15 = vadd.f32 %v3361_v26, %v731_v36 }
 0x234   :  { %v2864_v2 = vadd.f32 %v662_v58, %v3354_v1 }
 0x235   :  { %v1883_v63 = vmul.f32 -1.442695, %v2863_v41 }
 0x236   :  { %v1884_v4 = vmul.f32 -1.442695, %v2864_v2 }
 0x237   :  { %2912 = vpow2.f32 %v1883_v63 }
 0x238   :  { %2914 = vpow2.f32 %v1884_v4 }
 0x241   :  { %v2913_v5 = vpop.eup %2912 }
 0x242   :  { %v742_v7 = vadd.f32 1.0, %v2913_v5  ;;  %v2915_v11 = vpop.eup %2914 }
 0x243   :  { %v749_v13 = vadd.f32 1.0, %v2915_v11 }
 0x244   :  { %2916 = vrcp.f32 %v742_v7 }
 0x245   :  { %2918 = vrcp.f32 %v749_v13 }
 0x24e   :  { %v2917_v16 = vpop.eup %2916 }
 0x24f   :  { %v753_v21 = vmul.f32 %v2917_v16, %v752_v15  ;;  %v2919_v28 = vpop.eup %2918 }
 0x250   :  { %v756_v30 = vsub.f32 1.0, %v2919_v28  ;;  %v758_v33 = vmul.f32 %v2919_v28, %v593_v56 }
 0x251   :  { %v754_v22 = vadd.f32 %v753_v21, %v3338_v40 }
 0x253   :  { %2920 = vtanh.f32 %v754_v22 }
 0x25d   :  { %v2921_v31 = vpop.eup %2920 }
 0x25e   :  { %v757_v32 = vmul.f32 %v2921_v31, %v756_v30 }
 0x260   :  { %v759_v38 = vadd.f32 %v758_v33, %v757_v32 }
 0x262   :  { %825 = vmatmul.mubr.f32.vlgmr.msra.gmra.mrb[4].mxu0 %v759_v38  ;;  %2177 = vmatmul.mubr.f32.vlgmr.msra.gmra.mrb[12].mxu1 %v759_v38 }
 0x263   :  { %2560 = vmatpush1.bf16.msra.mxu0 %v3163_v9  ;;  %2591 = vmatpush3.bf16.msra.mxu1 %v3199_v35 }
 0x264   :  { %2562 = vmatprep.subr.bf16.mxu0 %v3166_v12  ;;  %2592 = vmatprep.subr.bf16.mxu1 %v3058_v34 }
 0x265   :  { %990 = vmatprep.mubr.f32.mxu0 %v3057_v0  ;;  %2211 = vmatprep.mubr.msk.f32.mxu1 %vm3059_vm2, %v3057_v0 }
 0x267   :  { %2564 = vmatpush1.bf16.msra.mxu0 %v3176_v18  ;;  %2594 = vmatpush3.bf16.msra.mxu1 %v3213_v45 }
 0x268   :  { %2566 = vmatprep.subr.bf16.mxu0 %v3179_v19  ;;  %2595 = vmatprep.subr.bf16.mxu1 %v3058_v34 }
 0x26b   :  { %2568 = vmatpush1.bf16.msra.mxu0 %v3187_v25  ;;  %2597 = vmatpush3.bf16.msra.mxu1 %v3230_v55 }
 0x26c   :  { %2570 = vmatprep.subr.bf16.mxu0 %v3193_v27  ;;  %2598 = vmatprep.subr.bf16.mxu1 %v3058_v34 }
 0x26f   :  { %2572 = vmatpush1.bf16.msra.mxu0 %v3206_v37  ;;  %2600 = vmatpush3.bf16.msra.mxu1 %v3250_v3 }
 0x270   :  { %2574 = vmatprep.subr.bf16.mxu0 %v3209_v39  ;;  %2601 = vmatprep.subr.bf16.mxu1 %v3058_v34 }
 0x273   :  { %2576 = vmatpush1.bf16.msra.mxu0 %v3223_v49  ;;  %2603 = vmatpush3.bf16.msra.mxu1 %v3267_v14 }
 0x274   :  { %2578 = vmatprep.subr.bf16.mxu0 %v3226_v50  ;;  %2604 = vmatprep.subr.bf16.mxu1 %v3058_v34 }
 0x277   :  { %2580 = vmatpush1.bf16.msra.mxu0 %v3240_v59  ;;  %2606 = vmatpush3.bf16.msra.mxu1 %v3279_v20 }
 0x278   :  { %2582 = vmatprep.subr.bf16.mxu0 %v3246_v61  ;;  %2607 = vmatprep.subr.bf16.mxu1 %v3058_v34 }
 0x27b   :  { %2584 = vmatpush1.bf16.msra.mxu0 %v3257_v6  ;;  %2609 = vmatpush3.bf16.msra.mxu1 %v3292_v24 }
 0x27c   :  { %2586 = vmatprep.subr.bf16.mxu0 %v3263_v10  ;;  %2610 = vmatprep.subr.bf16.mxu1 %v3058_v34 }
 0x27f   :  { %2588 = vmatpush1.bf16.msra.mxu0 %v3275_v17  ;;  %2612 = vmatpush3.bf16.msra.mxu1 %v3300_v29 }
 0x280   :  { %2614 = vmatprep.subr.bf16.mxu0 %v3161_v8  ;;  %2645 = vmatprep.subr.bf16.mxu1 %v3058_v34 }
 0x335   :  { %v826_v40 = vpop.f32.mrb[4].mxu0  ;;  %v897_v42 = vpop.f32.mrb[12].mxu1 }
 0x336   :  { %v2865_v44 = vadd.f32 %v826_v40, %v3352_v62  ;;  %v828_v47 = vpop.f32.mrb[5].mxu0  ;;  %v2178_v51 = vpop.f32.mrb[13].mxu1  ;;  %v918_v63 = vadd.f32 %v3361_v26, %v897_v42 }
 0x337   :  { %v2866_v56 = vadd.f32 %v828_v47, %v3354_v1 }
 0x338   :  { %v1885_v53 = vmul.f32 -1.442695, %v2865_v44 }
 0x339   :  { %v1886_v23 = vmul.f32 -1.442695, %v2866_v56 }
 0x33a   :  { %2922 = vpow2.f32 %v1885_v53 }
 0x33b   :  { %2924 = vpow2.f32 %v1886_v23 }
 0x344   :  { %v2923_v36 = vpop.eup %2922 }
 0x345   :  { %v908_v41 = vadd.f32 1.0, %v2923_v36  ;;  %v2925_v58 = vpop.eup %2924 }
 0x346   :  { %v915_v60 = vadd.f32 1.0, %v2925_v58 }
 0x347   :  { %2926 = vrcp.f32 %v908_v41 }
 0x348   :  { %2928 = vrcp.f32 %v915_v60 }
 0x351   :  { %v2927_v2 = vpop.eup %2926 }
 0x352   :  { %v919_v4 = vmul.f32 %v2927_v2, %v918_v63  ;;  %v2929_v7 = vpop.eup %2928 }
 0x353   :  { %v922_v11 = vsub.f32 1.0, %v2929_v7  ;;  %v924_v16 = vmul.f32 %v2929_v7, %v759_v38 }
 0x354   :  { %v920_v5 = vadd.f32 %v919_v4, %v3342_v46 }
 0x356   :  { %2930 = vtanh.f32 %v920_v5 }
 0x360   :  { %v2931_v13 = vpop.eup %2930 }
 0x361   :  { %v923_v15 = vmul.f32 %v2931_v13, %v922_v11 }
 0x363   :  { %v925_v21 = vadd.f32 %v924_v16, %v923_v15 }
 0x365   :  { %991 = vmatmul.mubr.f32.vlgmr.msra.gmra.mrb[6].mxu0 %v925_v21  ;;  %2212 = vmatmul.mubr.f32.vlgmr.msra.gmra.mrb[14].mxu1 %v925_v21 }
 0x366   :  { %2616 = vmatpush1.bf16.msra.mxu0 %v3163_v9  ;;  %2647 = vmatpush3.bf16.msra.mxu1 %v3199_v35 }
 0x367   :  { %2618 = vmatprep.subr.bf16.mxu0 %v3166_v12  ;;  %2648 = vmatprep.subr.bf16.mxu1 %v3058_v34 }
 0x368   :  { %1156 = vmatprep.mubr.f32.mxu0 %v3057_v0  ;;  %2246 = vmatprep.mubr.msk.f32.mxu1 %vm3059_vm2, %v3057_v0 }
 0x36a   :  { %2620 = vmatpush1.bf16.msra.mxu0 %v3176_v18  ;;  %2650 = vmatpush3.bf16.msra.mxu1 %v3213_v45 }
 0x36b   :  { %2622 = vmatprep.subr.bf16.mxu0 %v3179_v19  ;;  %2651 = vmatprep.subr.bf16.mxu1 %v3058_v34 }
 0x36e   :  { %2624 = vmatpush1.bf16.msra.mxu0 %v3187_v25  ;;  %2653 = vmatpush3.bf16.msra.mxu1 %v3230_v55 }
 0x36f   :  { %2626 = vmatprep.subr.bf16.mxu0 %v3193_v27  ;;  %2654 = vmatprep.subr.bf16.mxu1 %v3058_v34 }
 0x372   :  { %2628 = vmatpush1.bf16.msra.mxu0 %v3206_v37  ;;  %2656 = vmatpush3.bf16.msra.mxu1 %v3250_v3 }
 0x373   :  { %2630 = vmatprep.subr.bf16.mxu0 %v3209_v39  ;;  %2657 = vmatprep.subr.bf16.mxu1 %v3058_v34 }
 0x376   :  { %2632 = vmatpush1.bf16.msra.mxu0 %v3223_v49  ;;  %2659 = vmatpush3.bf16.msra.mxu1 %v3267_v14 }
 0x377   :  { %2634 = vmatprep.subr.bf16.mxu0 %v3226_v50  ;;  %2660 = vmatprep.subr.bf16.mxu1 %v3058_v34 }
 0x37a   :  { %2636 = vmatpush1.bf16.msra.mxu0 %v3240_v59  ;;  %2662 = vmatpush3.bf16.msra.mxu1 %v3279_v20 }
 0x37b   :  { %2638 = vmatprep.subr.bf16.mxu0 %v3246_v61  ;;  %2663 = vmatprep.subr.bf16.mxu1 %v3058_v34 }
 0x37e   :  { %2640 = vmatpush1.bf16.msra.mxu0 %v3257_v6  ;;  %2665 = vmatpush3.bf16.msra.mxu1 %v3292_v24 }
 0x37f   :  { %2642 = vmatprep.subr.bf16.mxu0 %v3263_v10  ;;  %2666 = vmatprep.subr.bf16.mxu1 %v3058_v34 }
 0x382   :  { %2644 = vmatpush1.bf16.msra.mxu0 %v3275_v17  ;;  %2668 = vmatpush3.bf16.msra.mxu1 %v3300_v29 }
 0x383   :  { %2670 = vmatprep.subr.bf16.mxu0 %v3161_v8  ;;  %2701 = vmatprep.subr.bf16.mxu1 %v3058_v34 }
 0x438   :  { %v992_v46 = vpop.f32.mrb[6].mxu0  ;;  %v1063_v22 = vpop.f32.mrb[14].mxu1 }
 0x439   :  { %v2867_v28 = vadd.f32 %v992_v46, %v3352_v62  ;;  %v994_v30 = vpop.f32.mrb[7].mxu0  ;;  %v2213_v31 = vpop.f32.mrb[15].mxu1  ;;  %v1084_v51 = vadd.f32 %v3361_v26, %v1063_v22 }
 0x43a   :  { %v2868_v33 = vadd.f32 %v994_v30, %v3354_v1 }
 0x43b   :  { %v1887_v32 = vmul.f32 -1.442695, %v2867_v28 }
 0x43c   :  { %v1888_v38 = vmul.f32 -1.442695, %v2868_v33 }
 0x43d   :  { %2932 = vpow2.f32 %v1887_v32 }
 0x43e   :  { %2934 = vpow2.f32 %v1888_v38 }
 0x447   :  { %v2933_v40 = vpop.eup %2932 }
 0x448   :  { %v1074_v42 = vadd.f32 1.0, %v2933_v40  ;;  %v2935_v44 = vpop.eup %2934 }
 0x449   :  { %v1081_v47 = vadd.f32 1.0, %v2935_v44 }
 0x44a   :  { %2936 = vrcp.f32 %v1074_v42 }
 0x44b   :  { %2938 = vrcp.f32 %v1081_v47 }
 0x454   :  { %v2937_v53 = vpop.eup %2936 }
 0x455   :  { %v1085_v56 = vmul.f32 %v2937_v53, %v1084_v51  ;;  %v2939_v36 = vpop.eup %2938 }
 0x456   :  { %v1088_v41 = vsub.f32 1.0, %v2939_v36  ;;  %v1090_v63 = vmul.f32 %v2939_v36, %v925_v21 }
 0x457   :  { %v1086_v23 = vadd.f32 %v1085_v56, %v3340_v43 }
 0x459   :  { %2940 = vtanh.f32 %v1086_v23 }
 0x463   :  { %v2941_v58 = vpop.eup %2940 }
 0x464   :  { %v1089_v60 = vmul.f32 %v2941_v58, %v1088_v41 }
 0x466   :  { %v1091_v2 = vadd.f32 %v1090_v63, %v1089_v60 }
 0x468   :  { %1157 = vmatmul.mubr.f32.vlgmr.msra.gmra.mrb[8].mxu0 %v1091_v2  ;;  %2247 = vmatmul.mubr.f32.vlgmr.msra.gmra.mrb[16].mxu1 %v1091_v2 }
 0x469   :  { %2672 = vmatpush1.bf16.msra.mxu0 %v3163_v9  ;;  %2703 = vmatpush3.bf16.msra.mxu1 %v3199_v35 }
 0x46a   :  { %2674 = vmatprep.subr.bf16.mxu0 %v3166_v12  ;;  %2704 = vmatprep.subr.bf16.mxu1 %v3058_v34 }
 0x46b   :  { %1322 = vmatprep.mubr.f32.mxu0 %v3057_v0  ;;  %2281 = vmatprep.mubr.msk.f32.mxu1 %vm3059_vm2, %v3057_v0 }
 0x46d   :  { %2676 = vmatpush1.bf16.msra.mxu0 %v3176_v18  ;;  %2706 = vmatpush3.bf16.msra.mxu1 %v3213_v45 }
 0x46e   :  { %2678 = vmatprep.subr.bf16.mxu0 %v3179_v19  ;;  %2707 = vmatprep.subr.bf16.mxu1 %v3058_v34 }
 0x471   :  { %2680 = vmatpush1.bf16.msra.mxu0 %v3187_v25  ;;  %2709 = vmatpush3.bf16.msra.mxu1 %v3230_v55 }
 0x472   :  { %2682 = vmatprep.subr.bf16.mxu0 %v3193_v27  ;;  %2710 = vmatprep.subr.bf16.mxu1 %v3058_v34 }
 0x475   :  { %2684 = vmatpush1.bf16.msra.mxu0 %v3206_v37  ;;  %2712 = vmatpush3.bf16.msra.mxu1 %v3250_v3 }
 0x476   :  { %2686 = vmatprep.subr.bf16.mxu0 %v3209_v39  ;;  %2713 = vmatprep.subr.bf16.mxu1 %v3058_v34 }
 0x479   :  { %2688 = vmatpush1.bf16.msra.mxu0 %v3223_v49  ;;  %2715 = vmatpush3.bf16.msra.mxu1 %v3267_v14 }
 0x47a   :  { %2690 = vmatprep.subr.bf16.mxu0 %v3226_v50  ;;  %2716 = vmatprep.subr.bf16.mxu1 %v3058_v34 }
 0x47d   :  { %2692 = vmatpush1.bf16.msra.mxu0 %v3240_v59  ;;  %2718 = vmatpush3.bf16.msra.mxu1 %v3279_v20 }
 0x47e   :  { %2694 = vmatprep.subr.bf16.mxu0 %v3246_v61  ;;  %2719 = vmatprep.subr.bf16.mxu1 %v3058_v34 }
 0x481   :  { %2696 = vmatpush1.bf16.msra.mxu0 %v3257_v6  ;;  %2721 = vmatpush3.bf16.msra.mxu1 %v3292_v24 }
 0x482   :  { %2698 = vmatprep.subr.bf16.mxu0 %v3263_v10  ;;  %2722 = vmatprep.subr.bf16.mxu1 %v3058_v34 }
 0x485   :  { %2700 = vmatpush1.bf16.msra.mxu0 %v3275_v17  ;;  %2724 = vmatpush3.bf16.msra.mxu1 %v3300_v29 }
 0x486   :  { %2726 = vmatprep.subr.bf16.mxu0 %v3161_v8  ;;  %2757 = vmatprep.subr.bf16.mxu1 %v3058_v34 }
 0x53b   :  { %v1158_v43 = vpop.f32.mrb[8].mxu0  ;;  %v1229_v4 = vpop.f32.mrb[16].mxu1 }
 0x53c   :  { %v2869_v5 = vadd.f32 %v1158_v43, %v3352_v62  ;;  %v1160_v7 = vpop.f32.mrb[9].mxu0  ;;  %v2248_v11 = vpop.f32.mrb[17].mxu1  ;;  %v1250_v30 = vadd.f32 %v3361_v26, %v1229_v4 }
 0x53d   :  { %v2870_v15 = vadd.f32 %v1160_v7, %v3354_v1 }
 0x53e   :  { %v1889_v13 = vmul.f32 -1.442695, %v2869_v5 }
 0x53f   :  { %v1890_v16 = vmul.f32 -1.442695, %v2870_v15 }
 0x540   :  { %2942 = vpow2.f32 %v1889_v13 }
 0x541   :  { %2944 = vpow2.f32 %v1890_v16 }
 0x54a   :  { %v2943_v21 = vpop.eup %2942 }
 0x54b   :  { %v1240_v46 = vadd.f32 1.0, %v2943_v21  ;;  %v2945_v22 = vpop.eup %2944 }
 0x54c   :  { %v1247_v28 = vadd.f32 1.0, %v2945_v22 }
 0x54d   :  { %2946 = vrcp.f32 %v1240_v46 }
 0x54e   :  { %2948 = vrcp.f32 %v1247_v28  ;;  %v1759_v28 = vld [vmem:[%s3676_s6 + $0x10] sm:$0xff] }
 0x557   :  { %v2947_v31 = vpop.eup %2946 }
 0x558   :  { %v1251_v32 = vmul.f32 %v2947_v31, %v1250_v30  ;;  %v2949_v38 = vpop.eup %2948  ;;  %v1761_v31 = vld [vmem:[%s3676_s6 + $0x20] sm:$0xff] }
 0x559   :  { %v1254_v40 = vsub.f32 1.0, %v2949_v38  ;;  %v1256_v47 = vmul.f32 %v2949_v38, %v1091_v2  ;;  %v1763_v38 = vld [vmem:[%s3676_s6 + $0x30] sm:$0xff] }
 0x55a   :  { %v1252_v33 = vadd.f32 %v1251_v32, %v3346_v52  ;;  %v1762_v32 = vld [vmem:[%s3676_s6 + $0x28] sm:$0xff] }
 0x55c   :  { %2950 = vtanh.f32 %v1252_v33  ;;  %v2844_v33 = vpack.c.bf16 %v1762_v32, %v1761_v31 }
 0x566   :  { %v2951_v42 = vpop.eup %2950 }
 0x567   :  { %v1255_v44 = vmul.f32 %v2951_v42, %v1254_v40  ;;  %v1764_v40 = vld [vmem:[%s3676_s6 + $0x38] sm:$0xff] }
 0x568   :  { %v2847_v42 = vpack.c.bf16 %v1764_v40, %v1763_v38 }
 0x569   :  { %v1257_v51 = vadd.f32 %v1256_v47, %v1255_v44  ;;  %v1765_v44 = vld [vmem:[%s3676_s6 + $0x40] sm:$0xff]  ;;  %v1766_v47 = vld [vmem:[%s3676_s6 + $0x48] sm:$0xff] }
 0x56b   :  { %1323 = vmatmul.mubr.f32.vlgmr.msra.gmra.mrb[10].mxu0 %v1257_v51  ;;  %2282 = vmatmul.mubr.f32.vlgmr.msra.gmra.mrb[18].mxu1 %v1257_v51 }
 0x56c   :  { %2728 = vmatpush1.bf16.msra.mxu0 %v3163_v9  ;;  %2759 = vmatpush3.bf16.msra.mxu1 %v3199_v35 }
 0x56d   :  { %2730 = vmatprep.subr.bf16.mxu0 %v3166_v12  ;;  %2760 = vmatprep.subr.bf16.mxu1 %v3058_v34 }
 0x56e   :  { %1488 = vmatprep.mubr.f32.mxu0 %v3057_v0  ;;  %2316 = vmatprep.mubr.msk.f32.mxu1 %vm3059_vm2, %v3057_v0 }
 0x570   :  { %2732 = vmatpush1.bf16.msra.mxu0 %v3176_v18  ;;  %2762 = vmatpush3.bf16.msra.mxu1 %v3213_v45 }
 0x571   :  { %2734 = vmatprep.subr.bf16.mxu0 %v3179_v19  ;;  %2763 = vmatprep.subr.bf16.mxu1 %v3058_v34 }
 0x574   :  { %2736 = vmatpush1.bf16.msra.mxu0 %v3187_v25  ;;  %2765 = vmatpush3.bf16.msra.mxu1 %v3230_v55 }
 0x575   :  { %2738 = vmatprep.subr.bf16.mxu0 %v3193_v27  ;;  %2766 = vmatprep.subr.bf16.mxu1 %v3058_v34 }
 0x578   :  { %2740 = vmatpush1.bf16.msra.mxu0 %v3206_v37  ;;  %2768 = vmatpush3.bf16.msra.mxu1 %v3250_v3 }
 0x579   :  { %2742 = vmatprep.subr.bf16.mxu0 %v3209_v39  ;;  %2769 = vmatprep.subr.bf16.mxu1 %v3058_v34 }
 0x57c   :  { %2744 = vmatpush1.bf16.msra.mxu0 %v3223_v49  ;;  %2771 = vmatpush3.bf16.msra.mxu1 %v3267_v14 }
 0x57d   :  { %2746 = vmatprep.subr.bf16.mxu0 %v3226_v50  ;;  %2772 = vmatprep.subr.bf16.mxu1 %v3058_v34 }
 0x580   :  { %2748 = vmatpush1.bf16.msra.mxu0 %v3240_v59  ;;  %2774 = vmatpush3.bf16.msra.mxu1 %v3279_v20 }
 0x581   :  { %2750 = vmatprep.subr.bf16.mxu0 %v3246_v61  ;;  %2775 = vmatprep.subr.bf16.mxu1 %v3058_v34 }
 0x584   :  { %2752 = vmatpush1.bf16.msra.mxu0 %v3257_v6  ;;  %2777 = vmatpush3.bf16.msra.mxu1 %v3292_v24 }
 0x585   :  { %2754 = vmatprep.subr.bf16.mxu0 %v3263_v10  ;;  %2778 = vmatprep.subr.bf16.mxu1 %v3058_v34 }
 0x588   :  { %2756 = vmatpush1.bf16.msra.mxu0 %v3275_v17  ;;  %2780 = vmatpush3.bf16.msra.mxu1 %v3300_v29 }
 0x589   :  { %2782 = vmatprep.subr.bf16.mxu0 %v3161_v8  ;;  %2813 = vmatprep.subr.bf16.mxu1 %v3058_v34 }
 0x63e   :  { %v1324_v52 = vpop.f32.mrb[10].mxu0  ;;  %v1395_v53 = vpop.f32.mrb[18].mxu1 }
 0x63f   :  { %v2871_v56 = vadd.f32 %v1324_v52, %v3352_v62  ;;  %v1326_v23 = vpop.f32.mrb[11].mxu0  ;;  %v2283_v36 = vpop.f32.mrb[19].mxu1  ;;  %v1416_v8 = vadd.f32 %v3361_v26, %v1395_v53  ;;  %v1767_v52 = vld [vmem:[%s3676_s6 + $0x50] sm:$0xff]  ;;  %v1768_v53 = vld [vmem:[%s3676_s6 + $0x58] sm:$0xff] }
 0x640   :  { %v2872_v58 = vadd.f32 %v1326_v23, %v3354_v1  ;;  %v1769_v23 = vld [vmem:[%s3676_s6 + $0x60] sm:$0xff]  ;;  %v1770_v36 = vld [vmem:[%s3676_s6 + $0x68] sm:$0xff] }
 0x641   :  { %v1891_v41 = vmul.f32 -1.442695, %v2871_v56  ;;  %v2853_v56 = vpack.c.bf16 %v1768_v53, %v1767_v52 }
 0x642   :  { %v1892_v60 = vmul.f32 -1.442695, %v2872_v58  ;;  %v1771_v58 = vld [vmem:[%s3676_s6 + $0x70] sm:$0xff] }
 0x643   :  { %2952 = vpow2.f32 %v1891_v41  ;;  %v2856_v41 = vpack.c.bf16 %v1770_v36, %v1769_v23 }
 0x644   :  { %2954 = vpow2.f32 %v1892_v60  ;;  %v1772_v60 = vld [vmem:[%s3676_s6 + $0x78] sm:$0xff] }
 0x64d   :  { %v2953_v63 = vpop.eup %2952 }
 0x64e   :  { %v1406_v2 = vadd.f32 1.0, %v2953_v63  ;;  %v2955_v43 = vpop.eup %2954  ;;  %v2859_v63 = vpack.c.bf16 %v1772_v60, %v1771_v58 }
 0x64f   :  { %v1413_v4 = vadd.f32 1.0, %v2955_v43 }
 0x650   :  { %2956 = vrcp.f32 %v1406_v2 }
 0x651   :  { %2958 = vrcp.f32 %v1413_v4 }
 0x65a   :  { %v2957_v5 = vpop.eup %2956 }
 0x65b   :  { %v1417_v7 = vmul.f32 %v2957_v5, %v1416_v8  ;;  %v2959_v13 = vpop.eup %2958 }
 0x65c   :  { %v1420_v15 = vsub.f32 1.0, %v2959_v13  ;;  %v1422_v46 = vmul.f32 %v2959_v13, %v1257_v51  ;;  %v2850_v51 = vpack.c.bf16 %v1766_v47, %v1765_v44 }
 0x65d   :  { %v1418_v11 = vadd.f32 %v1417_v7, %v3344_v48  ;;  %v1758_v48 = vld [vmem:[%s3676_s6 + $0x8] sm:$0xff] }
 0x65f   :  { %2960 = vtanh.f32 %v1418_v11 }
 0x669   :  { %v2961_v16 = vpop.eup %2960 }
 0x66a   :  { %v1421_v21 = vmul.f32 %v2961_v16, %v1420_v15 }
 0x66c   :  { %v1423_v22 = vadd.f32 %v1422_v46, %v1421_v21 }
 0x66e   :  { %1489 = vmatmul.mubr.f32.vlgmr.msra.gmra.mrb[12].mxu0 %v1423_v22  ;;  %2317 = vmatmul.mubr.f32.vlgmr.msra.gmra.mrb[20].mxu1 %v1423_v22 }
 0x66f   :  { %2784 = vmatpush1.bf16.msra.mxu0 %v3163_v9  ;;  %2815 = vmatpush3.bf16.msra.mxu1 %v3199_v35 }
 0x670   :  { %2786 = vmatprep.subr.bf16.mxu0 %v3166_v12  ;;  %2816 = vmatprep.subr.bf16.mxu1 %v3058_v34 }
 0x671   :  { %1654 = vmatprep.mubr.f32.mxu0 %v3057_v0  ;;  %2351 = vmatprep.mubr.msk.f32.mxu1 %vm3059_vm2, %v3057_v0 }
 0x673   :  { %2788 = vmatpush1.bf16.msra.mxu0 %v3176_v18  ;;  %2818 = vmatpush3.bf16.msra.mxu1 %v3213_v45 }
 0x674   :  { %2790 = vmatprep.subr.bf16.mxu0 %v3179_v19  ;;  %2819 = vmatprep.subr.bf16.mxu1 %v3058_v34 }
 0x677   :  { %2792 = vmatpush1.bf16.msra.mxu0 %v3187_v25  ;;  %2821 = vmatpush3.bf16.msra.mxu1 %v3230_v55 }
 0x678   :  { %2794 = vmatprep.subr.bf16.mxu0 %v3193_v27  ;;  %2822 = vmatprep.subr.bf16.mxu1 %v3058_v34 }
 0x67b   :  { %2796 = vmatpush1.bf16.msra.mxu0 %v3206_v37  ;;  %2824 = vmatpush3.bf16.msra.mxu1 %v3250_v3 }
 0x67c   :  { %2798 = vmatprep.subr.bf16.mxu0 %v3209_v39  ;;  %2825 = vmatprep.subr.bf16.mxu1 %v3058_v34 }
 0x67f   :  { %2800 = vmatpush1.bf16.msra.mxu0 %v3223_v49  ;;  %2827 = vmatpush3.bf16.msra.mxu1 %v3267_v14 }
 0x680   :  { %2802 = vmatprep.subr.bf16.mxu0 %v3226_v50  ;;  %2828 = vmatprep.subr.bf16.mxu1 %v3058_v34 }
 0x683   :  { %2804 = vmatpush1.bf16.msra.mxu0 %v3240_v59  ;;  %2830 = vmatpush3.bf16.msra.mxu1 %v3279_v20 }
 0x684   :  { %2806 = vmatprep.subr.bf16.mxu0 %v3246_v61  ;;  %2831 = vmatprep.subr.bf16.mxu1 %v3058_v34 }
 0x687   :  { %2808 = vmatpush1.bf16.msra.mxu0 %v3257_v6  ;;  %2833 = vmatpush3.bf16.msra.mxu1 %v3292_v24 }
 0x688   :  { %2810 = vmatprep.subr.bf16.mxu0 %v3263_v10  ;;  %2834 = vmatprep.subr.bf16.mxu1 %v3058_v34 }
 0x68b   :  { %2812 = vmatpush1.bf16.msra.mxu0 %v3275_v17  ;;  %2836 = vmatpush3.bf16.msra.mxu1 %v3300_v29  ;;  %v1757_v29 = vld [vmem:[%s3676_s6] sm:$0xff] }
 0x68c   :  { %2837 = vmatprep.subr.bf16.mxu0 %v3058_v34 }
 0x741   :  { %v1490_v9 = vpop.f32.mrb[12].mxu0  ;;  %v1561_v12 = vpop.f32.mrb[20].mxu1 }
 0x742   :  { %v2873_v18 = vadd.f32 %v1490_v9, %v3352_v62  ;;  %v1492_v19 = vpop.f32.mrb[13].mxu0  ;;  %v2318_v25 = vpop.f32.mrb[21].mxu1  ;;  %v1582_v55 = vadd.f32 %v3361_v26, %v1561_v12 }
 0x743   :  { %v2874_v35 = vadd.f32 %v1492_v19, %v3354_v1 }
 0x744   :  { %v1893_v27 = vmul.f32 -1.442695, %v2873_v18 }
 0x745   :  { %v1894_v37 = vmul.f32 -1.442695, %v2874_v35  ;;  %v1897_v35 = vld [vmem:[#allocation7] ss:$0 sm:$0xff] }
 0x746   :  { %2962 = vpow2.f32 %v1893_v27 }
 0x747   :  { %2964 = vpow2.f32 %v1894_v37 }
 0x750   :  { %v2963_v39 = vpop.eup %2962 }
 0x751   :  { %v1572_v45 = vadd.f32 1.0, %v2963_v39  ;;  %v2965_v49 = vpop.eup %2964 }
 0x752   :  { %v1579_v50 = vadd.f32 1.0, %v2965_v49 }
 0x753   :  { %2966 = vrcp.f32 %v1572_v45 }
 0x754   :  { %2968 = vrcp.f32 %v1579_v50 }
 0x75d   :  { %v2967_v59 = vpop.eup %2966 }
 0x75e   :  { %v1583_v61 = vmul.f32 %v2967_v59, %v1582_v55  ;;  %v2969_v6 = vpop.eup %2968 }
 0x75f   :  { %v1586_v10 = vsub.f32 1.0, %v2969_v6  ;;  %v1588_v20 = vmul.f32 %v2969_v6, %v1423_v22 }
 0x760   :  { %v1584_v3 = vadd.f32 %v1583_v61, %v3350_v57  ;;  %v2838_v57 = vpack.c.bf16 %v1758_v48, %v1757_v29 }
 0x762   :  { %2970 = vtanh.f32 %v1584_v3 }
 0x76c   :  { %v2971_v14 = vpop.eup %2970 }
 0x76d   :  { %v1587_v17 = vmul.f32 %v2971_v14, %v1586_v10 }
 0x76f   :  { %v3598_v24 = vadd.f32 %v1588_v20, %v1587_v17 }
 0x771   :  { %1655 = vmatmul.mubr.f32.vlgmr.msra.gmra.mrb[14].mxu0 %v3598_v24  ;;  %2352 = vmatmul.mubr.f32.vlgmr.msra.gmra.mrb[22].mxu1 %v3598_v24 }
 0x772   :  { %2386 = vmatprep.mubr.msk.f32.mxu0 %vm3059_vm2, %v3057_v0  ;;  %2839 = vmatpush3.bf16.msra.mxu0 %v2838_v57  ;;  %v1760_v0 = vld [vmem:[%s3676_s6 + $0x18] sm:$0xff] }
 0x773   :  { %2840 = vmatprep.subr.bf16.mxu0 %v3058_v34  ;;  %v2841_v30 = vpack.c.bf16 %v1760_v0, %v1759_v28 }
 0x776   :  { %2842 = vmatpush3.bf16.msra.mxu0 %v2841_v30 }
 0x777   :  { %2843 = vmatprep.subr.bf16.mxu0 %v3058_v34 }
 0x77a   :  { %2845 = vmatpush3.bf16.msra.mxu0 %v2844_v33 }
 0x77b   :  { %2846 = vmatprep.subr.bf16.mxu0 %v3058_v34 }
 0x77e   :  { %2848 = vmatpush3.bf16.msra.mxu0 %v2847_v42 }
 0x77f   :  { %2849 = vmatprep.subr.bf16.mxu0 %v3058_v34 }
 0x782   :  { %2851 = vmatpush3.bf16.msra.mxu0 %v2850_v51 }
 0x783   :  { %2852 = vmatprep.subr.bf16.mxu0 %v3058_v34 }
 0x786   :  { %2854 = vmatpush3.bf16.msra.mxu0 %v2853_v56 }
 0x787   :  { %2855 = vmatprep.subr.bf16.mxu0 %v3058_v34 }
 0x78a   :  { %2857 = vmatpush3.bf16.msra.mxu0 %v2856_v41 }
 0x78b   :  { %2858 = vmatprep.subr.bf16.mxu0 %v3058_v34 }
 0x78e   :  { %2860 = vmatpush3.bf16.msra.mxu0 %v2859_v63 }
 0x844   :  { %v1656_v2 = vpop.f32.mrb[14].mxu0  ;;  %v1727_v43 = vpop.f32.mrb[22].mxu1 }
 0x845   :  { %v2875_v4 = vadd.f32 %v1656_v2, %v3352_v62  ;;  %v1658_v8 = vpop.f32.mrb[15].mxu0  ;;  %v2353_v5 = vpop.f32.mrb[23].mxu1  ;;  %v1748_v34 = vadd.f32 %v3361_v26, %v1727_v43 }
 0x846   :  { %v2876_v11 = vadd.f32 %v1658_v8, %v3354_v1 }
 0x847   :  { %v1895_v7 = vmul.f32 -1.442695, %v2875_v4 }
 0x848   :  { %v1896_v13 = vmul.f32 -1.442695, %v2876_v11 }
 0x849   :  { %2972 = vpow2.f32 %v1895_v7 }
 0x84a   :  { %2974 = vpow2.f32 %v1896_v13 }
 0x853   :  { %v2973_v15 = vpop.eup %2972 }
 0x854   :  { %v1738_v16 = vadd.f32 1.0, %v2973_v15  ;;  %v2975_v21 = vpop.eup %2974 }
 0x855   :  { %v1745_v46 = vadd.f32 1.0, %v2975_v21 }
 0x856   :  { %2976 = vrcp.f32 %v1738_v16 }
 0x857   :  { %2978 = vrcp.f32 %v1745_v46 }
 0x860   :  { %v2977_v22 = vpop.eup %2976 }
 0x861   :  { %v1749_v9 = vmul.f32 %v2977_v22, %v1748_v34  ;;  %v2979_v12 = vpop.eup %2978 }
 0x862   :  { %v1752_v18 = vsub.f32 1.0, %v2979_v12  ;;  %v1754_v25 = vmul.f32 %v2979_v12, %v3598_v24 }
 0x863   :  { %v1750_v62 = vadd.f32 %v1749_v9, %v3348_v54 }
 0x865   :  { %2980 = vtanh.f32 %v1750_v62 }
 0x86f   :  { %v2981_v19 = vpop.eup %2980 }
 0x870   :  { %v1753_v1 = vmul.f32 %v2981_v19, %v1752_v18 }
 0x872   :  { %v1755_v27 = vadd.f32 %v1754_v25, %v1753_v1 }
 0x874   :  { %1756 = vst [vmem:[%s3679_s9] sm:$0xff] %v1755_v27  ;;  %2387 = vmatmul.mubr.f32.vlgmr.msra.gmra.mrb[16].mxu0 %v1755_v27 }
 0x947   :  { %v1846_v26 = vpop.f32.mrb[16].mxu0 }
 0x948   :  { %v1847_v37 = vadd.f32 %v1897_v35, %v1846_v26  ;;  %v2388_v39 = vpop.f32.mrb[17].mxu0 }
 0x94a   :  { %1850 = vst [vmem:[%s3678_s8] sm:$0xff] %v1847_v37 }
 0x94b   :  { %1859 = vsyncpa [#allocation4], 1 }
 0x94c   :  { %1860 = vsyncpa [#allocation6], 1 }

</bundles_post_ra>
